<compile_context>
chip_gen: v6e
topology: v6e:2x2x1
jax: 0.10.0
libtpu: 0.0.40
codegen_flags: <defaults>
</compile_context>

<pallas_src>
import functools

import jax
import jax.numpy as jnp
from jax import lax
from jax.experimental import pallas as pl
from jax.experimental.pallas import tpu as pltpu

_LANE = 128
_TM = 128   # output-row tile
_TK = 128   # adj contraction tile


def _ceil_to(v, m):
    return ((v + m - 1) // m) * m


def _pad2d(a, rows, cols):
    r, c = a.shape
    return jnp.pad(a, ((0, rows - r), (0, cols - c)))


# ----------------------------------------------------------------------------
# Kernel 1: support = x @ W   (tiny matmul, row-tiled, done once per layer)
# ----------------------------------------------------------------------------
def _support_kernel(x_ref, w_ref, out_ref):
    out_ref[...] = jnp.dot(
        x_ref[...], w_ref[...], preferred_element_type=jnp.float32
    ).astype(out_ref.dtype)


def support_matmul(x_p, w_p, *, tm=_TM):
    n_p, f_in = x_p.shape
    f_out = w_p.shape[1]
    return pl.pallas_call(
        _support_kernel,
        out_shape=jax.ShapeDtypeStruct((n_p, f_out), jnp.float32),
        grid=(n_p // tm,),
        in_specs=[
            pl.BlockSpec((tm, f_in), lambda i: (i, 0)),
            pl.BlockSpec((f_in, f_out), lambda i: (0, 0)),
        ],
        out_specs=pl.BlockSpec((tm, f_out), lambda i: (i, 0)),
        compiler_params=pltpu.CompilerParams(
            dimension_semantics=("parallel",),
            vmem_limit_bytes=32 * 1024 * 1024,
        ),
    )(x_p, w_p)


# ----------------------------------------------------------------------------
# Kernel 2: out = adj @ support + b  (+ optional ReLU / fused softmax epilogue)
# Tiled over (row tiles i, contraction tiles k) with a VMEM accumulator.
# ----------------------------------------------------------------------------
def _aggregate_kernel(adj_ref, sup_ref, b_ref, out_ref, acc_ref, *,
                      apply_relu, softmax_split):
    k = pl.program_id(1)

    @pl.when(k == 0)
    def _():
        acc_ref[...] = jnp.zeros_like(acc_ref)

    acc_ref[...] += jnp.dot(
        adj_ref[...], sup_ref[...], preferred_element_type=jnp.float32
    )

    @pl.when(k == pl.num_programs(1) - 1)
    def _():
        out = acc_ref[...] + b_ref[...]          # b is [1, Fp], broadcasts
        if apply_relu:
            out = jnp.maximum(out, 0.0)
        if softmax_split is not None:
            # Fused epilogue: per-group numerically-stable (log_)softmax
            # inside the lane-padded slab.  Columns [0, c1) hold x1,
            # [c1, c1+c2) hold x2; column c1+c2 receives softmax(x1)[:, -1].
            c1, c2 = softmax_split
            tm, fp = out.shape
            cols = lax.broadcasted_iota(jnp.int32, (tm, fp), 1)
            neg = jnp.float32(-jnp.inf)

            g1 = jnp.where(cols < c1, out, neg)
            m1 = jnp.max(g1, axis=-1, keepdims=True)
            e1 = jnp.exp(g1 - m1)
            s1 = jnp.sum(e1, axis=-1, keepdims=True)
            ls1 = (out - m1) - jnp.log(s1)
            p_last = jnp.sum(
                jnp.where(cols == c1 - 1, e1, 0.0), axis=-1, keepdims=True
            ) / s1

            in2 = (cols >= c1) & (cols < c1 + c2)
            g2 = jnp.where(in2, out, neg)
            m2 = jnp.max(g2, axis=-1, keepdims=True)
            e2 = jnp.exp(g2 - m2)
            s2 = jnp.sum(e2, axis=-1, keepdims=True)
            ls2 = (out - m2) - jnp.log(s2)

            out = jnp.where(
                cols < c1, ls1,
                jnp.where(in2, ls2,
                          jnp.where(cols == c1 + c2, p_last, 0.0)))
        out_ref[...] = out.astype(out_ref.dtype)


def aggregate(adj_p, sup_p, b_p, *, tm=_TM, tk=_TK,
              apply_relu=False, softmax_split=None):
    n_p = adj_p.shape[0]
    f_p = sup_p.shape[1]
    kernel = functools.partial(
        _aggregate_kernel, apply_relu=apply_relu, softmax_split=softmax_split)
    return pl.pallas_call(
        kernel,
        out_shape=jax.ShapeDtypeStruct((n_p, f_p), jnp.float32),
        grid=(n_p // tm, n_p // tk),
        in_specs=[
            pl.BlockSpec((tm, tk), lambda i, k: (i, k)),     # adj tile
            pl.BlockSpec((tk, f_p), lambda i, k: (k, 0)),    # support tile
            pl.BlockSpec((1, f_p), lambda i, k: (0, 0)),     # bias
        ],
        out_specs=pl.BlockSpec((tm, f_p), lambda i, k: (i, 0)),
        scratch_shapes=[pltpu.VMEM((tm, f_p), jnp.float32)],
        compiler_params=pltpu.CompilerParams(
            dimension_semantics=("parallel", "arbitrary"),
            vmem_limit_bytes=32 * 1024 * 1024,
        ),
    )(adj_p, sup_p, b_p)


# ----------------------------------------------------------------------------
# GCN model (parameters + forward)
# ----------------------------------------------------------------------------
def init_gcn_params(key, nfeat, nhid, nclass):
    """Deterministic init matching GraphConvolution shapes: W [in,out], b [out]."""
    ks = jax.random.split(key, 6)

    def uniform(k, shape, fan_out):
        stdv = 1.0 / jnp.sqrt(jnp.float32(fan_out))
        return jax.random.uniform(k, shape, jnp.float32, -stdv, stdv)

    return {
        "gc1_w": uniform(ks[0], (nfeat, nhid), nhid),
        "gc1_b": uniform(ks[1], (nhid,), nhid),
        "gc2_w": uniform(ks[2], (nhid, nclass), nclass),
        "gc2_b": uniform(ks[3], (nclass,), nclass),
        "gc3_w": uniform(ks[4], (nhid, 2), 2),
        "gc3_b": uniform(ks[5], (2,), 2),
    }


def gcn_forward(params, x, adj):
    n, nfeat = x.shape
    nhid = params["gc1_w"].shape[1]
    nclass = params["gc2_w"].shape[1]
    c2 = params["gc3_w"].shape[1]          # == 2

    n_p = _ceil_to(max(n, _TM), max(_TM, _TK))
    h_p_dim = _ceil_to(nhid, _LANE)
    # leave one extra valid column for packing softmax(x1)[:, -1]
    f23_p = _ceil_to(nclass + c2 + 1, _LANE)

    # Pad operands once (rows of x / adj; lanes of W / b).
    x_p = _pad2d(x.astype(jnp.float32), n_p, nfeat)
    adj_p = _pad2d(adj.astype(jnp.float32), n_p, n_p)
    w1_p = _pad2d(params["gc1_w"], nfeat, h_p_dim)
    b1_p = _pad2d(params["gc1_b"].reshape(1, nhid), 1, h_p_dim)

    # Fuse gc2 + gc3: one adj pass over the packed W2||W3 slab.
    w23 = jnp.concatenate([params["gc2_w"], params["gc3_w"]], axis=1)
    b23 = jnp.concatenate([params["gc2_b"], params["gc3_b"]], axis=0)
    w23_p = _pad2d(w23, h_p_dim, f23_p)
    b23_p = _pad2d(b23.reshape(1, nclass + c2), 1, f23_p)

    # ---- layer 1: h = relu(adj @ (x @ W1) + b1) -----------------------------
    sup1 = support_matmul(x_p, w1_p)
    h_p = aggregate(adj_p, sup1, b1_p, apply_relu=True)
    # TODO(synk): F.dropout(training=True) is stochastic; eval-mode identity here.

    # ---- layers 2+3 fused, with softmax epilogue ----------------------------
    sup23 = support_matmul(h_p, w23_p)
    out_slab = aggregate(adj_p, sup23, b23_p, softmax_split=(nclass, c2))

    ls1 = out_slab[:n, :nclass]
    ls2 = out_slab[:n, nclass:nclass + c2]
    p_last = out_slab[:n, nclass + c2]
    return ls1, ls2, p_last


# ----------------------------------------------------------------------------
# Demo / smoke test
# ----------------------------------------------------------------------------
if __name__ == "__main__":
    N, nfeat, nhid, nclass = 256, 16, 32, 4

    key = jax.random.PRNGKey(0)
    k_params, k_x, k_adj = jax.random.split(key, 3)

    params = init_gcn_params(k_params, nfeat, nhid, nclass)
    x = jax.random.normal(k_x, (N, nfeat), jnp.float32)

    # Deterministic, symmetrically-normalized dense adjacency with self-loops.
    a = (jax.random.uniform(k_adj, (N, N)) > 0.9).astype(jnp.float32)
    a = jnp.maximum(a, a.T) + jnp.eye(N, dtype=jnp.float32)
    deg = jnp.sum(a, axis=1)
    d_inv_sqrt = 1.0 / jnp.sqrt(deg)
    adj = a * d_inv_sqrt[:, None] * d_inv_sqrt[None, :]

    log_p1, log_p2, p_last = jax.jit(gcn_forward)(params, x, adj)
    jax.block_until_ready((log_p1, log_p2, p_last))

    assert log_p1.shape == (N, nclass)
    assert log_p2.shape == (N, 2)
    assert p_last.shape == (N,)

    # Pure-JAX reference check.
    def reference(params, x, adj):
        h = jax.nn.relu(adj @ (x @ params["gc1_w"]) + params["gc1_b"])
        x1 = adj @ (h @ params["gc2_w"]) + params["gc2_b"]
        x2 = adj @ (h @ params["gc3_w"]) + params["gc3_b"]
        return (jax.nn.log_softmax(x1, axis=1),
                jax.nn.log_softmax(x2, axis=1),
                jax.nn.softmax(x1, axis=1)[:, -1])

    r1, r2, r3 = reference(params, x, adj)
    assert jnp.allclose(log_p1, r1, atol=1e-4, rtol=1e-4)
    assert jnp.allclose(log_p2, r2, atol=1e-4, rtol=1e-4)
    assert jnp.allclose(p_last, r3, atol=1e-4, rtol=1e-4)
    assert jnp.allclose(jnp.sum(jnp.exp(log_p1), axis=1), 1.0, atol=1e-5)
    assert jnp.allclose(jnp.sum(jnp.exp(log_p2), axis=1), 1.0, atol=1e-5)

    print("KERNEL_OK")
</pallas_src>

<mosaic_0001>
module attributes {stable_mosaic.version = 11 : i64} {
  func.func @_support_kernel(%arg0: i32, %arg1: memref<128x16xf32, #tpu.memory_space<vmem>>, %arg2: memref<16x128xf32, #tpu.memory_space<vmem>>, %arg3: memref<128x128xf32, #tpu.memory_space<vmem>>) attributes {dimension_semantics = [#tpu.dimension_semantics<parallel>], iteration_bounds = array<i64: 2>, scalar_prefetch = 0 : i64, scratch_operands = 0 : i64, tpu.core_type = #tpu.core_type<tc>, window_params = [{transform_indices = @transform_0, window_bounds = array<i64: 128, 16>}, {pipeline_mode = #tpu.pipeline_mode<synchronous>, transform_indices = @transform_1, window_bounds = array<i64: 16, 128>}, {transform_indices = @transform_2, window_bounds = array<i64: 128, 128>}]} {
    %c0 = arith.constant 0 : index
    %c0_0 = arith.constant 0 : index
    %0 = vector.load %arg1[%c0, %c0_0] : memref<128x16xf32, #tpu.memory_space<vmem>>, vector<128x16xf32>
    %c0_1 = arith.constant 0 : index
    %c0_2 = arith.constant 0 : index
    %1 = vector.load %arg2[%c0_1, %c0_2] : memref<16x128xf32, #tpu.memory_space<vmem>>, vector<16x128xf32>
    %cst = arith.constant dense<0.000000e+00> : vector<128x128xf32>
    %2 = tpu.matmul %0, %1, %cst {dimension_numbers = #tpu.dot_dimension_numbers<[1], [0], [0], [1], [0, 0, 1, 1], [], []>} : vector<128x16xf32>, vector<16x128xf32>, vector<128x128xf32> -> vector<128x128xf32>
    %c0_3 = arith.constant 0 : index
    %c0_4 = arith.constant 0 : index
    %3 = vector.load %arg3[%c0_3, %c0_4] : memref<128x128xf32, #tpu.memory_space<vmem>>, vector<128x128xf32>
    tpu.vector_store %arg3[%c0_3, %c0_4], %2 {strides = array<i32>} : memref<128x128xf32, #tpu.memory_space<vmem>>, vector<128x128xf32>,
    return
  }
  func.func @transform_0(%arg0: i32) -> (i32, i32) {
    %c0_i32 = arith.constant 0 : i32
    %c0_i32_0 = arith.constant 0 : i32
    return %arg0, %c0_i32 : i32, i32
  }
  func.func @transform_1(%arg0: i32) -> (i32, i32) {
    %c0_i32 = arith.constant 0 : i32
    %c0_i32_0 = arith.constant 0 : i32
    %c0_i32_1 = arith.constant 0 : i32
    return %c0_i32, %c0_i32_0 : i32, i32
  }
  func.func @transform_2(%arg0: i32) -> (i32, i32) {
    %c0_i32 = arith.constant 0 : i32
    %c0_i32_0 = arith.constant 0 : i32
    return %arg0, %c0_i32 : i32, i32
  }
}

module attributes {stable_mosaic.version = 11 : i64} {
  func.func @_aggregate_kernel(%arg0: i32, %arg1: i32, %arg2: memref<128x128xf32, #tpu.memory_space<vmem>>, %arg3: memref<128x128xf32, #tpu.memory_space<vmem>>, %arg4: memref<1x128xf32, #tpu.memory_space<vmem>>, %arg5: memref<128x128xf32, #tpu.memory_space<vmem>>, %arg6: memref<128x128xf32, #tpu.memory_space<vmem>>) attributes {dimension_semantics = [#tpu.dimension_semantics<parallel>, #tpu.dimension_semantics<arbitrary>], iteration_bounds = array<i64: 2, 2>, scalar_prefetch = 0 : i64, scratch_operands = 1 : i64, tpu.core_type = #tpu.core_type<tc>, window_params = [{transform_indices = @transform_0, window_bounds = array<i64: 128, 128>}, {transform_indices = @transform_1, window_bounds = array<i64: 128, 128>}, {pipeline_mode = #tpu.pipeline_mode<synchronous>, transform_indices = @transform_2, window_bounds = array<i64: 1, 128>}, {transform_indices = @transform_3, window_bounds = array<i64: 128, 128>}]} {
    %c0_i32 = arith.constant 0 : i32
    %0 = arith.cmpi eq, %arg1, %c0_i32 : i32
    %1 = arith.extui %0 : i1 to i32
    %c0_i32_0 = arith.constant 0 : i32
    %2 = arith.cmpi ne, %1, %c0_i32_0 : i32
    scf.if %2 {
      %cst_9 = arith.constant 0.000000e+00 : f32
      %12 = vector.broadcast %cst_9 : f32 to vector<128x128xf32>
      %c0_10 = arith.constant 0 : index
      %c0_11 = arith.constant 0 : index
      %13 = vector.load %arg6[%c0_10, %c0_11] : memref<128x128xf32, #tpu.memory_space<vmem>>, vector<128x128xf32>
      tpu.vector_store %arg6[%c0_10, %c0_11], %12 {strides = array<i32>} : memref<128x128xf32, #tpu.memory_space<vmem>>, vector<128x128xf32>,
    } else {
    }
    %c0 = arith.constant 0 : index
    %c0_1 = arith.constant 0 : index
    %3 = vector.load %arg6[%c0, %c0_1] : memref<128x128xf32, #tpu.memory_space<vmem>>, vector<128x128xf32>
    %c0_2 = arith.constant 0 : index
    %c0_3 = arith.constant 0 : index
    %4 = vector.load %arg2[%c0_2, %c0_3] : memref<128x128xf32, #tpu.memory_space<vmem>>, vector<128x128xf32>
    %c0_4 = arith.constant 0 : index
    %c0_5 = arith.constant 0 : index
    %5 = vector.load %arg3[%c0_4, %c0_5] : memref<128x128xf32, #tpu.memory_space<vmem>>, vector<128x128xf32>
    %cst = arith.constant dense<0.000000e+00> : vector<128x128xf32>
    %6 = tpu.matmul %4, %5, %cst {dimension_numbers = #tpu.dot_dimension_numbers<[1], [0], [0], [1], [0, 0, 1, 1], [], []>} : vector<128x128xf32>, vector<128x128xf32>, vector<128x128xf32> -> vector<128x128xf32>
    %7 = arith.addf %3, %6 : vector<128x128xf32>
    %c0_6 = arith.constant 0 : index
    %c0_7 = arith.constant 0 : index
    %8 = vector.load %arg6[%c0_6, %c0_7] : memref<128x128xf32, #tpu.memory_space<vmem>>, vector<128x128xf32>
    tpu.vector_store %arg6[%c0_6, %c0_7], %7 {strides = array<i32>} : memref<128x128xf32, #tpu.memory_space<vmem>>, vector<128x128xf32>,
    %c1_i32 = arith.constant 1 : i32
    %9 = arith.cmpi eq, %arg1, %c1_i32 : i32
    %10 = arith.extui %9 : i1 to i32
    %c0_i32_8 = arith.constant 0 : i32
    %11 = arith.cmpi ne, %10, %c0_i32_8 : i32
    scf.if %11 {
      %c0_9 = arith.constant 0 : index
      %c0_10 = arith.constant 0 : index
      %12 = vector.load %arg6[%c0_9, %c0_10] : memref<128x128xf32, #tpu.memory_space<vmem>>, vector<128x128xf32>
      %c0_11 = arith.constant 0 : index
      %c0_12 = arith.constant 0 : index
      %13 = vector.load %arg4[%c0_11, %c0_12] : memref<1x128xf32, #tpu.memory_space<vmem>>, vector<1x128xf32>
      %14 = vector.broadcast %13 : vector<1x128xf32> to vector<128x128xf32>
      %15 = arith.addf %12, %14 : vector<128x128xf32>
      %cst_13 = arith.constant 0.000000e+00 : f32
      %16 = vector.broadcast %cst_13 : f32 to vector<128x128xf32>
      %17 = arith.maximumf %15, %16 : vector<128x128xf32>
      %c0_14 = arith.constant 0 : index
      %c0_15 = arith.constant 0 : index
      %18 = vector.load %arg5[%c0_14, %c0_15] : memref<128x128xf32, #tpu.memory_space<vmem>>, vector<128x128xf32>
      tpu.vector_store %arg5[%c0_14, %c0_15], %17 {strides = array<i32>} : memref<128x128xf32, #tpu.memory_space<vmem>>, vector<128x128xf32>,
    } else {
    }
    return
  }
  func.func @transform_0(%arg0: i32, %arg1: i32) -> (i32, i32) {
    %c0_i32 = arith.constant 0 : i32
    return %arg0, %arg1 : i32, i32
  }
  func.func @transform_1(%arg0: i32, %arg1: i32) -> (i32, i32) {
    %c0_i32 = arith.constant 0 : i32
    %c0_i32_0 = arith.constant 0 : i32
    return %arg1, %c0_i32 : i32, i32
  }
  func.func @transform_2(%arg0: i32, %arg1: i32) -> (i32, i32) {
    %c0_i32 = arith.constant 0 : i32
    %c0_i32_0 = arith.constant 0 : i32
    %c0_i32_1 = arith.constant 0 : i32
    return %c0_i32, %c0_i32_0 : i32, i32
  }
  func.func @transform_3(%arg0: i32, %arg1: i32) -> (i32, i32) {
    %c0_i32 = arith.constant 0 : i32
    %c0_i32_0 = arith.constant 0 : i32
    return %arg0, %c0_i32 : i32, i32
  }
}

module attributes {stable_mosaic.version = 11 : i64} {
  func.func @_support_kernel(%arg0: i32, %arg1: memref<128x128xf32, #tpu.memory_space<vmem>>, %arg2: memref<128x128xf32, #tpu.memory_space<vmem>>, %arg3: memref<128x128xf32, #tpu.memory_space<vmem>>) attributes {dimension_semantics = [#tpu.dimension_semantics<parallel>], iteration_bounds = array<i64: 2>, scalar_prefetch = 0 : i64, scratch_operands = 0 : i64, tpu.core_type = #tpu.core_type<tc>, window_params = [{transform_indices = @transform_0, window_bounds = array<i64: 128, 128>}, {pipeline_mode = #tpu.pipeline_mode<synchronous>, transform_indices = @transform_1, window_bounds = array<i64: 128, 128>}, {transform_indices = @transform_2, window_bounds = array<i64: 128, 128>}]} {
    %c0 = arith.constant 0 : index
    %c0_0 = arith.constant 0 : index
    %0 = vector.load %arg1[%c0, %c0_0] : memref<128x128xf32, #tpu.memory_space<vmem>>, vector<128x128xf32>
    %c0_1 = arith.constant 0 : index
    %c0_2 = arith.constant 0 : index
    %1 = vector.load %arg2[%c0_1, %c0_2] : memref<128x128xf32, #tpu.memory_space<vmem>>, vector<128x128xf32>
    %cst = arith.constant dense<0.000000e+00> : vector<128x128xf32>
    %2 = tpu.matmul %0, %1, %cst {dimension_numbers = #tpu.dot_dimension_numbers<[1], [0], [0], [1], [0, 0, 1, 1], [], []>} : vector<128x128xf32>, vector<128x128xf32>, vector<128x128xf32> -> vector<128x128xf32>
    %c0_3 = arith.constant 0 : index
    %c0_4 = arith.constant 0 : index
    %3 = vector.load %arg3[%c0_3, %c0_4] : memref<128x128xf32, #tpu.memory_space<vmem>>, vector<128x128xf32>
    tpu.vector_store %arg3[%c0_3, %c0_4], %2 {strides = array<i32>} : memref<128x128xf32, #tpu.memory_space<vmem>>, vector<128x128xf32>,
    return
  }
  func.func @transform_0(%arg0: i32) -> (i32, i32) {
    %c0_i32 = arith.constant 0 : i32
    %c0_i32_0 = arith.constant 0 : i32
    return %arg0, %c0_i32 : i32, i32
  }
  func.func @transform_1(%arg0: i32) -> (i32, i32) {
    %c0_i32 = arith.constant 0 : i32
    %c0_i32_0 = arith.constant 0 : i32
    %c0_i32_1 = arith.constant 0 : i32
    return %c0_i32, %c0_i32_0 : i32, i32
  }
  func.func @transform_2(%arg0: i32) -> (i32, i32) {
    %c0_i32 = arith.constant 0 : i32
    %c0_i32_0 = arith.constant 0 : i32
    return %arg0, %c0_i32 : i32, i32
  }
}

module attributes {stable_mosaic.version = 11 : i64} {
  func.func @_aggregate_kernel(%arg0: i32, %arg1: i32, %arg2: memref<128x128xf32, #tpu.memory_space<vmem>>, %arg3: memref<128x128xf32, #tpu.memory_space<vmem>>, %arg4: memref<1x128xf32, #tpu.memory_space<vmem>>, %arg5: memref<128x128xf32, #tpu.memory_space<vmem>>, %arg6: memref<128x128xf32, #tpu.memory_space<vmem>>) attributes {dimension_semantics = [#tpu.dimension_semantics<parallel>, #tpu.dimension_semantics<arbitrary>], iteration_bounds = array<i64: 2, 2>, scalar_prefetch = 0 : i64, scratch_operands = 1 : i64, tpu.core_type = #tpu.core_type<tc>, window_params = [{transform_indices = @transform_0, window_bounds = array<i64: 128, 128>}, {transform_indices = @transform_1, window_bounds = array<i64: 128, 128>}, {pipeline_mode = #tpu.pipeline_mode<synchronous>, transform_indices = @transform_2, window_bounds = array<i64: 1, 128>}, {transform_indices = @transform_3, window_bounds = array<i64: 128, 128>}]} {
    %c0_i32 = arith.constant 0 : i32
    %0 = arith.cmpi eq, %arg1, %c0_i32 : i32
    %1 = arith.extui %0 : i1 to i32
    %c0_i32_0 = arith.constant 0 : i32
    %2 = arith.cmpi ne, %1, %c0_i32_0 : i32
    scf.if %2 {
      %cst_9 = arith.constant 0.000000e+00 : f32
      %12 = vector.broadcast %cst_9 : f32 to vector<128x128xf32>
      %c0_10 = arith.constant 0 : index
      %c0_11 = arith.constant 0 : index
      %13 = vector.load %arg6[%c0_10, %c0_11] : memref<128x128xf32, #tpu.memory_space<vmem>>, vector<128x128xf32>
      tpu.vector_store %arg6[%c0_10, %c0_11], %12 {strides = array<i32>} : memref<128x128xf32, #tpu.memory_space<vmem>>, vector<128x128xf32>,
    } else {
    }
    %c0 = arith.constant 0 : index
    %c0_1 = arith.constant 0 : index
    %3 = vector.load %arg6[%c0, %c0_1] : memref<128x128xf32, #tpu.memory_space<vmem>>, vector<128x128xf32>
    %c0_2 = arith.constant 0 : index
    %c0_3 = arith.constant 0 : index
    %4 = vector.load %arg2[%c0_2, %c0_3] : memref<128x128xf32, #tpu.memory_space<vmem>>, vector<128x128xf32>
    %c0_4 = arith.constant 0 : index
    %c0_5 = arith.constant 0 : index
    %5 = vector.load %arg3[%c0_4, %c0_5] : memref<128x128xf32, #tpu.memory_space<vmem>>, vector<128x128xf32>
    %cst = arith.constant dense<0.000000e+00> : vector<128x128xf32>
    %6 = tpu.matmul %4, %5, %cst {dimension_numbers = #tpu.dot_dimension_numbers<[1], [0], [0], [1], [0, 0, 1, 1], [], []>} : vector<128x128xf32>, vector<128x128xf32>, vector<128x128xf32> -> vector<128x128xf32>
    %7 = arith.addf %3, %6 : vector<128x128xf32>
    %c0_6 = arith.constant 0 : index
    %c0_7 = arith.constant 0 : index
    %8 = vector.load %arg6[%c0_6, %c0_7] : memref<128x128xf32, #tpu.memory_space<vmem>>, vector<128x128xf32>
    tpu.vector_store %arg6[%c0_6, %c0_7], %7 {strides = array<i32>} : memref<128x128xf32, #tpu.memory_space<vmem>>, vector<128x128xf32>,
    %c1_i32 = arith.constant 1 : i32
    %9 = arith.cmpi eq, %arg1, %c1_i32 : i32
    %10 = arith.extui %9 : i1 to i32
    %c0_i32_8 = arith.constant 0 : i32
    %11 = arith.cmpi ne, %10, %c0_i32_8 : i32
    scf.if %11 {
      %c0_9 = arith.constant 0 : index
      %c0_10 = arith.constant 0 : index
      %12 = vector.load %arg6[%c0_9, %c0_10] : memref<128x128xf32, #tpu.memory_space<vmem>>, vector<128x128xf32>
      %c0_11 = arith.constant 0 : index
      %c0_12 = arith.constant 0 : index
      %13 = vector.load %arg4[%c0_11, %c0_12] : memref<1x128xf32, #tpu.memory_space<vmem>>, vector<1x128xf32>
      %14 = vector.broadcast %13 : vector<1x128xf32> to vector<128x128xf32>
      %15 = arith.addf %12, %14 : vector<128x128xf32>
      %16 = tpu.iota {dimensions = array<i32: 1>} : vector<128x128xi32>
      %c4_i32 = arith.constant 4 : i32
      %17 = vector.broadcast %c4_i32 : i32 to vector<128x128xi32>
      %18 = arith.cmpi slt, %16, %17 : vector<128x128xi32>
      %cst_13 = arith.constant 0xFF800000 : f32
      %19 = vector.broadcast %cst_13 : f32 to vector<128x128xf32>
      %20 = arith.select %18, %15, %19 : vector<128x128xi1>, vector<128x128xf32>
      %cst_14 = arith.constant dense<0xFF800000> : vector<128xf32>
      %21 = vector.multi_reduction <maximumf>, %20, %cst_14 [1] : vector<128x128xf32> to vector<128xf32>
      %22 = vector.shape_cast %21 : vector<128xf32> to vector<128x1xf32>
      %23 = vector.broadcast %22 : vector<128x1xf32> to vector<128x128xf32>
      %24 = arith.subf %20, %23 : vector<128x128xf32>
      %25 = math.exp %24 : vector<128x128xf32>
      %cst_15 = arith.constant dense<0.000000e+00> : vector<128xf32>
      %26 = vector.multi_reduction <add>, %25, %cst_15 [1] : vector<128x128xf32> to vector<128xf32>
      %27 = vector.shape_cast %26 : vector<128xf32> to vector<128x1xf32>
      %28 = vector.broadcast %22 : vector<128x1xf32> to vector<128x128xf32>
      %29 = arith.subf %15, %28 : vector<128x128xf32>
      %30 = math.log %27 : vector<128x1xf32>
      %31 = vector.broadcast %30 : vector<128x1xf32> to vector<128x128xf32>
      %32 = arith.subf %29, %31 : vector<128x128xf32>
      %c3_i32 = arith.constant 3 : i32
      %33 = vector.broadcast %c3_i32 : i32 to vector<128x128xi32>
      %34 = arith.cmpi eq, %16, %33 : vector<128x128xi32>
      %cst_16 = arith.constant 0.000000e+00 : f32
      %35 = vector.broadcast %cst_16 : f32 to vector<128x128xf32>
      %36 = arith.select %34, %25, %35 : vector<128x128xi1>, vector<128x128xf32>
      %cst_17 = arith.constant dense<0.000000e+00> : vector<128xf32>
      %37 = vector.multi_reduction <add>, %36, %cst_17 [1] : vector<128x128xf32> to vector<128xf32>
      %38 = vector.shape_cast %37 : vector<128xf32> to vector<128x1xf32>
      %39 = arith.divf %38, %27 : vector<128x1xf32>
      %c4_i32_18 = arith.constant 4 : i32
      %40 = vector.broadcast %c4_i32_18 : i32 to vector<128x128xi32>
      %41 = arith.cmpi sge, %16, %40 : vector<128x128xi32>
      %c6_i32 = arith.constant 6 : i32
      %42 = vector.broadcast %c6_i32 : i32 to vector<128x128xi32>
      %43 = arith.cmpi slt, %16, %42 : vector<128x128xi32>
      %44 = arith.andi %41, %43 : vector<128x128xi1>
      %cst_19 = arith.constant 0xFF800000 : f32
      %45 = vector.broadcast %cst_19 : f32 to vector<128x128xf32>
      %46 = arith.select %44, %15, %45 : vector<128x128xi1>, vector<128x128xf32>
      %cst_20 = arith.constant dense<0xFF800000> : vector<128xf32>
      %47 = vector.multi_reduction <maximumf>, %46, %cst_20 [1] : vector<128x128xf32> to vector<128xf32>
      %48 = vector.shape_cast %47 : vector<128xf32> to vector<128x1xf32>
      %49 = vector.broadcast %48 : vector<128x1xf32> to vector<128x128xf32>
      %50 = arith.subf %46, %49 : vector<128x128xf32>
      %51 = math.exp %50 : vector<128x128xf32>
      %cst_21 = arith.constant dense<0.000000e+00> : vector<128xf32>
      %52 = vector.multi_reduction <add>, %51, %cst_21 [1] : vector<128x128xf32> to vector<128xf32>
      %53 = vector.shape_cast %52 : vector<128xf32> to vector<128x1xf32>
      %54 = vector.broadcast %48 : vector<128x1xf32> to vector<128x128xf32>
      %55 = arith.subf %15, %54 : vector<128x128xf32>
      %56 = math.log %53 : vector<128x1xf32>
      %57 = vector.broadcast %56 : vector<128x1xf32> to vector<128x128xf32>
      %58 = arith.subf %55, %57 : vector<128x128xf32>
      %c4_i32_22 = arith.constant 4 : i32
      %59 = vector.broadcast %c4_i32_22 : i32 to vector<128x128xi32>
      %60 = arith.cmpi slt, %16, %59 : vector<128x128xi32>
      %c6_i32_23 = arith.constant 6 : i32
      %61 = vector.broadcast %c6_i32_23 : i32 to vector<128x128xi32>
      %62 = arith.cmpi eq, %16, %61 : vector<128x128xi32>
      %cst_24 = arith.constant 0.000000e+00 : f32
      %63 = vector.shape_cast %39 : vector<128x1xf32> to vector<128x1xf32>
      %64 = vector.broadcast %63 : vector<128x1xf32> to vector<128x128xf32>
      %65 = vector.broadcast %cst_24 : f32 to vector<128x128xf32>
      %66 = arith.select %62, %64, %65 : vector<128x128xi1>, vector<128x128xf32>
      %67 = arith.select %44, %58, %66 : vector<128x128xi1>, vector<128x128xf32>
      %68 = arith.select %60, %32, %67 : vector<128x128xi1>, vector<128x128xf32>
      %c0_25 = arith.constant 0 : index
      %c0_26 = arith.constant 0 : index
      %69 = vector.load %arg5[%c0_25, %c0_26] : memref<128x128xf32, #tpu.memory_space<vmem>>, vector<128x128xf32>
      tpu.vector_store %arg5[%c0_25, %c0_26], %68 {strides = array<i32>} : memref<128x128xf32, #tpu.memory_space<vmem>>, vector<128x128xf32>,
    } else {
    }
    return
  }
  func.func @transform_0(%arg0: i32, %arg1: i32) -> (i32, i32) {
    %c0_i32 = arith.constant 0 : i32
    return %arg0, %arg1 : i32, i32
  }
  func.func @transform_1(%arg0: i32, %arg1: i32) -> (i32, i32) {
    %c0_i32 = arith.constant 0 : i32
    %c0_i32_0 = arith.constant 0 : i32
    return %arg1, %c0_i32 : i32, i32
  }
  func.func @transform_2(%arg0: i32, %arg1: i32) -> (i32, i32) {
    %c0_i32 = arith.constant 0 : i32
    %c0_i32_0 = arith.constant 0 : i32
    %c0_i32_1 = arith.constant 0 : i32
    return %c0_i32, %c0_i32_0 : i32, i32
  }
  func.func @transform_3(%arg0: i32, %arg1: i32) -> (i32, i32) {
    %c0_i32 = arith.constant 0 : i32
    %c0_i32_0 = arith.constant 0 : i32
    return %arg0, %c0_i32 : i32, i32
  }
}

</mosaic_0001>

<bundles_post_ra>
// kernel: gcn_forward.6
= control target key start
LH: loop header
LB: loop body
LE: loop exit
PB: predicated region body
PF: predicated region fallthrough
CT: control target
= control target key end

     0   :  { %s558_s9 = smov 0   ;;  %s668_s0 = inlined_call_operand.vmem [shape: f32[256,128], index: 0, kind: input, shape index: {}]   ;;  %s669_s1 = inlined_call_operand.vmem [shape: f32[128,128], index: 1, kind: input, shape index: {}]   ;;  %s670_s2 = inlined_call_operand.vmem [shape: f32[256,128], index: 2, kind: output, shape index: {}]  }
   0x1 LB: > { %s396_s10 = sadd.s32 4294967295, %s541_s9   ;;  %p400_p0 = scmp.ge.s32.totalorder %s541_s9, 1  ;;  %s541_s9 = sphi %s558_s9, %s12_s9  }
   0x2   : > { %p113_p1 = scmp.lt.s32.totalorder %s541_s9, 3 }
   0x4   : > { %p114_p2 = pnand %p400_p0, %p113_p1 }
   0x5   : > { %s401_s27 = sshll.u32 (!%p114_p2), %s396_s10, 4 }
   0x6   : > { %117 = sbr.rel (%p114_p2) target bundleno = 253 (0xfd), region = 28  ;;  %p136_p3 = scmp.lt.s32.totalorder (!%p114_p2), %s401_s27, 31 }
   0xb   : > { %v178_v0 = vld [vmem:[%s669_s1 + $0x78] sm:$0xff]  ;;  %v177_v1 = vld [vmem:[%s669_s1 + $0x70] sm:$0xff]  ;;  %v176_v2 = vld [vmem:[%s669_s1 + $0x68] sm:$0xff]  ;;  %s672_s27 = smov (!%p136_p3, %s401_s27), 31 }
   0xc   : > { %439 = vmatprep.subr.mxu0 %v178_v0  ;;  %495 = vmatprep.subr.mxu1 %v178_v0  ;;  %v175_v3 = vld [vmem:[%s669_s1 + $0x60] sm:$0xff]  ;;  %v174_v4 = vld [vmem:[%s669_s1 + $0x58] sm:$0xff]  ;;  %v173_v5 = vld [vmem:[%s669_s1 + $0x50] sm:$0xff]  ;;  %s402_s13 = sshll.u32 %s672_s27, 3 }
   0xd   : > { %440 = vmatpush3.msra.mxu0 %v178_v0  ;;  %511 = vmatpush3.msra.mxu1 %v178_v0  ;;  %v172_v6 = vld [vmem:[%s669_s1 + $0x48] sm:$0xff]  ;;  %v171_v7 = vld [vmem:[%s669_s1 + $0x40] sm:$0xff]  ;;  %v170_v8 = vld [vmem:[%s669_s1 + $0x38] sm:$0xff]  ;;  %s621_s18 = scalar_lea.vmem %s668_s0, %s402_s13  ;;  %s647_s23 = scalar_lea.vmem %s670_s2, %s402_s13 }
   0xe   : > { %441 = vmatprep.subr.mxu0 %v177_v1  ;;  %496 = vmatprep.subr.mxu1 %v177_v1  ;;  %v169_v9 = vld [vmem:[%s669_s1 + $0x30] sm:$0xff]  ;;  %v168_v10 = vld [vmem:[%s669_s1 + $0x28] sm:$0xff]  ;;  %v167_v11 = vld [vmem:[%s669_s1 + $0x20] sm:$0xff] }
   0xf   : > { %442 = vmatpush3.msra.mxu0 %v177_v1  ;;  %512 = vmatpush3.msra.mxu1 %v177_v1  ;;  %v166_v12 = vld [vmem:[%s669_s1 + $0x18] sm:$0xff]  ;;  %v165_v13 = vld [vmem:[%s669_s1 + $0x10] sm:$0xff]  ;;  %v164_v14 = vld [vmem:[%s669_s1 + $0x8] sm:$0xff] }
  0x10   : > { %443 = vmatprep.subr.mxu0 %v176_v2  ;;  %497 = vmatprep.subr.mxu1 %v176_v2  ;;  %v163_v15 = vld [vmem:[%s669_s1] sm:$0xff]  ;;  %v148_v18 = vld [vmem:[%s621_s18 + $0x8] sm:$0xff]  ;;  %v149_v20 = vld [vmem:[%s621_s18 + $0x10] sm:$0xff] }
  0x11   : > { %444 = vmatpush3.msra.mxu0 %v176_v2  ;;  %513 = vmatpush3.msra.mxu1 %v176_v2  ;;  %v147_v16 = vld [vmem:[%s621_s18] sm:$0xff]  ;;  %v156_v19 = vld [vmem:[%s621_s18 + $0x48] sm:$0xff]  ;;  %v157_v21 = vld [vmem:[%s621_s18 + $0x50] sm:$0xff] }
  0x12   : > { %445 = vmatprep.subr.mxu0 %v175_v3  ;;  %498 = vmatprep.subr.mxu1 %v175_v3  ;;  %v155_v17 = vld [vmem:[%s621_s18 + $0x40] sm:$0xff]  ;;  %v150_v22 = vld [vmem:[%s621_s18 + $0x18] sm:$0xff]  ;;  %v152_v26 = vld [vmem:[%s621_s18 + $0x28] sm:$0xff] }
  0x13   : > { %446 = vmatpush3.msra.mxu0 %v175_v3  ;;  %514 = vmatpush3.msra.mxu1 %v175_v3  ;;  %v158_v23 = vld [vmem:[%s621_s18 + $0x58] sm:$0xff]  ;;  %v151_v24 = vld [vmem:[%s621_s18 + $0x20] sm:$0xff]  ;;  %v160_v27 = vld [vmem:[%s621_s18 + $0x68] sm:$0xff] }
  0x14   : > { %447 = vmatprep.subr.mxu0 %v174_v4  ;;  %499 = vmatprep.subr.mxu1 %v174_v4  ;;  %v159_v25 = vld [vmem:[%s621_s18 + $0x60] sm:$0xff]  ;;  %v153_v28 = vld [vmem:[%s621_s18 + $0x30] sm:$0xff]  ;;  %v154_v30 = vld [vmem:[%s621_s18 + $0x38] sm:$0xff] }
  0x15   : > { %448 = vmatpush3.msra.mxu0 %v174_v4  ;;  %515 = vmatpush3.msra.mxu1 %v174_v4  ;;  %v161_v29 = vld [vmem:[%s621_s18 + $0x70] sm:$0xff]  ;;  %v162_v31 = vld [vmem:[%s621_s18 + $0x78] sm:$0xff] }
  0x16   : > { %449 = vmatprep.subr.mxu0 %v173_v5  ;;  %500 = vmatprep.subr.mxu1 %v173_v5 }
  0x17   : > { %450 = vmatpush3.msra.mxu0 %v173_v5  ;;  %516 = vmatpush3.msra.mxu1 %v173_v5 }
  0x18   : > { %451 = vmatprep.subr.mxu0 %v172_v6  ;;  %501 = vmatprep.subr.mxu1 %v172_v6 }
  0x19   : > { %452 = vmatpush3.msra.mxu0 %v172_v6  ;;  %517 = vmatpush3.msra.mxu1 %v172_v6 }
  0x1a   : > { %453 = vmatprep.subr.mxu0 %v171_v7  ;;  %502 = vmatprep.subr.mxu1 %v171_v7 }
  0x1b   : > { %454 = vmatpush3.msra.mxu0 %v171_v7  ;;  %518 = vmatpush3.msra.mxu1 %v171_v7 }
  0x1c   : > { %455 = vmatprep.subr.mxu0 %v170_v8  ;;  %503 = vmatprep.subr.mxu1 %v170_v8 }
  0x1d   : > { %456 = vmatpush3.msra.mxu0 %v170_v8  ;;  %519 = vmatpush3.msra.mxu1 %v170_v8 }
  0x1e   : > { %457 = vmatprep.subr.mxu0 %v169_v9  ;;  %504 = vmatprep.subr.mxu1 %v169_v9 }
  0x1f   : > { %458 = vmatpush3.msra.mxu0 %v169_v9  ;;  %520 = vmatpush3.msra.mxu1 %v169_v9 }
  0x20   : > { %459 = vmatprep.subr.mxu0 %v168_v10  ;;  %505 = vmatprep.subr.mxu1 %v168_v10 }
  0x21   : > { %460 = vmatpush3.msra.mxu0 %v168_v10  ;;  %521 = vmatpush3.msra.mxu1 %v168_v10 }
  0x22   : > { %461 = vmatprep.subr.mxu0 %v167_v11  ;;  %506 = vmatprep.subr.mxu1 %v167_v11 }
  0x23   : > { %462 = vmatpush3.msra.mxu0 %v167_v11  ;;  %522 = vmatpush3.msra.mxu1 %v167_v11 }
  0x24   : > { %463 = vmatprep.subr.mxu0 %v166_v12  ;;  %507 = vmatprep.subr.mxu1 %v166_v12 }
  0x25   : > { %464 = vmatpush3.msra.mxu0 %v166_v12  ;;  %523 = vmatpush3.msra.mxu1 %v166_v12 }
  0x26   : > { %465 = vmatprep.subr.mxu0 %v165_v13  ;;  %508 = vmatprep.subr.mxu1 %v165_v13 }
  0x27   : > { %466 = vmatpush3.msra.mxu0 %v165_v13  ;;  %524 = vmatpush3.msra.mxu1 %v165_v13 }
  0x28   : > { %467 = vmatprep.subr.mxu0 %v164_v14  ;;  %509 = vmatprep.subr.mxu1 %v164_v14 }
  0x29   : > { %468 = vmatpush3.msra.mxu0 %v164_v14  ;;  %525 = vmatpush3.msra.mxu1 %v164_v14 }
  0x2a   : > { %469 = vmatprep.subr.mxu0 %v163_v15  ;;  %510 = vmatprep.subr.mxu1 %v163_v15 }
  0x2b   : > { %470 = vmatpush3.msra.mxu0 %v163_v15  ;;  %526 = vmatpush3.msra.mxu1 %v163_v15 }
  0x2c   : > { %471 = vmatprep.mubr.f32.mxu0 %v147_v16  ;;  %483 = vmatprep.mubr.f32.mxu1 %v155_v17 }
  0x2d   : > { %472 = vmatmul.mubr.f32.vlgmr.msra.gmra.mxu0 %v148_v18  ;;  %484 = vmatmul.mubr.f32.vlgmr.msra.gmra.mxu1 %v156_v19 }
  0x2e   : > { %474 = vmatprep.mubr.f32.mxu0 %v149_v20  ;;  %486 = vmatprep.mubr.f32.mxu1 %v157_v21 }
  0x31   : > { %475 = vmatmul.mubr.f32.gmra.mxu0 %v150_v22  ;;  %487 = vmatmul.mubr.f32.gmra.mxu1 %v158_v23 }
  0x32   : > { %477 = vmatprep.mubr.f32.mxu0 %v151_v24  ;;  %489 = vmatprep.mubr.f32.mxu1 %v159_v25 }
  0x35   : > { %478 = vmatmul.mubr.f32.gmra.mxu0 %v152_v26  ;;  %490 = vmatmul.mubr.f32.gmra.mxu1 %v160_v27 }
  0x36   : > { %480 = vmatprep.mubr.f32.mxu0 %v153_v28  ;;  %492 = vmatprep.mubr.f32.mxu1 %v161_v29 }
  0x39   : > { %481 = vmatmul.mubr.f32.gmra.mxu0 %v154_v30  ;;  %493 = vmatmul.mubr.f32.gmra.mxu1 %v162_v31 }
  0xed   : > { %v473_v32 = vpop.f32.mrf.mxu0  ;;  %v485_v33 = vpop.f32.mrf.mxu1 }
  0xee   : > { %325 = vst [vmem:[%s647_s23 + $0x8] sm:$0xff] %v473_v32  ;;  %333 = vst [vmem:[%s647_s23 + $0x48] sm:$0xff] %v485_v33 }
  0xef   : > { %v245_v34 = vpop.f32.mrf.mxu0  ;;  %v285_v35 = vpop.f32.mrf.mxu1 }
  0xf0   : > { %324 = vst [vmem:[%s647_s23] sm:$0xff] %v245_v34  ;;  %332 = vst [vmem:[%s647_s23 + $0x40] sm:$0xff] %v285_v35 }
  0xf1   : > { %v476_v36 = vpop.f32.mrf.mxu0  ;;  %v488_v37 = vpop.f32.mrf.mxu1 }
  0xf2   : > { %327 = vst [vmem:[%s647_s23 + $0x18] sm:$0xff] %v476_v36  ;;  %335 = vst [vmem:[%s647_s23 + $0x58] sm:$0xff] %v488_v37 }
  0xf3   : > { %v255_v38 = vpop.f32.mrf.mxu0  ;;  %v295_v39 = vpop.f32.mrf.mxu1 }
  0xf4   : > { %326 = vst [vmem:[%s647_s23 + $0x10] sm:$0xff] %v255_v38  ;;  %334 = vst [vmem:[%s647_s23 + $0x50] sm:$0xff] %v295_v39 }
  0xf5   : > { %v479_v40 = vpop.f32.mrf.mxu0  ;;  %v491_v41 = vpop.f32.mrf.mxu1 }
  0xf6   : > { %329 = vst [vmem:[%s647_s23 + $0x28] sm:$0xff] %v479_v40  ;;  %337 = vst [vmem:[%s647_s23 + $0x68] sm:$0xff] %v491_v41 }
  0xf7   : > { %v265_v42 = vpop.f32.mrf.mxu0  ;;  %v305_v43 = vpop.f32.mrf.mxu1 }
  0xf8   : > { %328 = vst [vmem:[%s647_s23 + $0x20] sm:$0xff] %v265_v42  ;;  %336 = vst [vmem:[%s647_s23 + $0x60] sm:$0xff] %v305_v43 }
  0xf9   : > { %v482_v44 = vpop.f32.mrf.mxu0  ;;  %v494_v45 = vpop.f32.mrf.mxu1 }
  0xfa   : > { %331 = vst [vmem:[%s647_s23 + $0x38] sm:$0xff] %v482_v44  ;;  %339 = vst [vmem:[%s647_s23 + $0x78] sm:$0xff] %v494_v45 }
  0xfb   : > { %v275_v46 = vpop.f32.mrf.mxu0  ;;  %v315_v47 = vpop.f32.mrf.mxu1 }
  0xfc   : > { %330 = vst [vmem:[%s647_s23 + $0x30] sm:$0xff] %v275_v46  ;;  %338 = vst [vmem:[%s647_s23 + $0x70] sm:$0xff] %v315_v47 }
  0xfd PF: > { %s12_s9 = sadd.s32 1, %s541_s9  }
  0xfe   : > { %p9_p4 = scmp.ge.s32.totalorder %s12_s9, 4  }
 0x100   :  { %11 = sbr.rel (!%p9_p4) target bundleno = 1 (0x1), region = 58 }

// kernel: gcn_forward.4
= control target key start
LH: loop header
LB: loop body
LE: loop exit
PB: predicated region body
PF: predicated region fallthrough
CT: control target
= control target key end

     0   :  { %s539_s9 = smov 0   ;;  %s603_s0 = inlined_call_operand.vmem [shape: f32[256,16], index: 0, kind: input, shape index: {}]   ;;  %s604_s1 = inlined_call_operand.vmem [shape: f32[16,128], index: 1, kind: input, shape index: {}]   ;;  %s605_s2 = inlined_call_operand.vmem [shape: f32[256,128], index: 2, kind: output, shape index: {}]  }
   0x1 LB: > { %s431_s10 = sadd.s32 4294967295, %s522_s9   ;;  %p435_p0 = scmp.ge.s32.totalorder %s522_s9, 1  ;;  %s522_s9 = sphi %s539_s9, %s12_s9  }
   0x2   : > { %p113_p1 = scmp.lt.s32.totalorder %s522_s9, 3 }
   0x4   : > { %p114_p2 = pnand %p435_p0, %p113_p1 }
   0x5   : > { %s436_s15 = sshll.u32 (!%p114_p2), %s431_s10, 4 }
   0x6   : > { %117 = sbr.rel (%p114_p2) target bundleno = 225 (0xe1), region = 28  ;;  %p136_p3 = scmp.lt.s32.totalorder (!%p114_p2), %s436_s15, 31 }
   0xb   : > { %v164_v0 = vld [vmem:[%s604_s1 + $0x8] sm:$0xff]  ;;  %v163_v1 = vld [vmem:[%s604_s1] sm:$0xff]  ;;  %s607_s15 = smov (!%p136_p3, %s436_s15), 31  ;;  %vm165_vm0 = vcmask 130048  }
   0xc   : > { %476 = vmatprep.subr.mxu0 %v164_v0  ;;  %504 = vmatprep.subr.mxu1 %v164_v0  ;;  %s437_s16 = sshll.u32 %s607_s15, 3 }
   0xd   : > { %477 = vmatpush3.msra.mxu0 %v164_v0  ;;  %506 = vmatpush3.msra.mxu1 %v164_v0  ;;  %s139_s19 = scalar_lea.vmem %s603_s0, %s437_s16  ;;  %s582_s22 = scalar_lea.vmem %s605_s2, %s437_s16 }
   0xe   : > { %478 = vmatprep.subr.mxu0 %v163_v1  ;;  %505 = vmatprep.subr.mxu1 %v163_v1  ;;  %v147_v2 = vld [vmem:[%s139_s19] sm:$0xff]  ;;  %v148_v4 = vld [vmem:[%s139_s19 + $0x8] sm:$0xff]  ;;  %v149_v6 = vld [vmem:[%s139_s19 + $0x10] sm:$0xff] }
   0xf   : > { %479 = vmatpush3.msra.mxu0 %v163_v1  ;;  %507 = vmatpush3.msra.mxu1 %v163_v1  ;;  %v155_v3 = vld [vmem:[%s139_s19 + $0x40] sm:$0xff]  ;;  %v156_v5 = vld [vmem:[%s139_s19 + $0x48] sm:$0xff]  ;;  %v157_v7 = vld [vmem:[%s139_s19 + $0x50] sm:$0xff] }
  0x10   : > { %480 = vmatprep.mubr.msk.f32.mxu0 %vm165_vm0, %v147_v2  ;;  %492 = vmatprep.mubr.msk.f32.mxu1 %vm165_vm0, %v155_v3  ;;  %v150_v8 = vld [vmem:[%s139_s19 + $0x18] sm:$0xff]  ;;  %v151_v10 = vld [vmem:[%s139_s19 + $0x20] sm:$0xff]  ;;  %v152_v12 = vld [vmem:[%s139_s19 + $0x28] sm:$0xff] }
  0x11   : > { %481 = vmatmul.mubr.msk.f32.vlgmr.msra.gmra.mxu0 %vm165_vm0, %v148_v4  ;;  %493 = vmatmul.mubr.msk.f32.vlgmr.msra.gmra.mxu1 %vm165_vm0, %v156_v5  ;;  %v158_v9 = vld [vmem:[%s139_s19 + $0x58] sm:$0xff]  ;;  %v159_v11 = vld [vmem:[%s139_s19 + $0x60] sm:$0xff]  ;;  %v160_v13 = vld [vmem:[%s139_s19 + $0x68] sm:$0xff] }
  0x12   : > { %483 = vmatprep.mubr.msk.f32.mxu0 %vm165_vm0, %v149_v6  ;;  %495 = vmatprep.mubr.msk.f32.mxu1 %vm165_vm0, %v157_v7  ;;  %v153_v14 = vld [vmem:[%s139_s19 + $0x30] sm:$0xff]  ;;  %v154_v16 = vld [vmem:[%s139_s19 + $0x38] sm:$0xff] }
  0x13   : > { %v161_v15 = vld [vmem:[%s139_s19 + $0x70] sm:$0xff]  ;;  %v162_v17 = vld [vmem:[%s139_s19 + $0x78] sm:$0xff] }
  0x15   : > { %484 = vmatmul.mubr.msk.f32.gmra.mxu0 %vm165_vm0, %v150_v8  ;;  %496 = vmatmul.mubr.msk.f32.gmra.mxu1 %vm165_vm0, %v158_v9 }
  0x16   : > { %486 = vmatprep.mubr.msk.f32.mxu0 %vm165_vm0, %v151_v10  ;;  %498 = vmatprep.mubr.msk.f32.mxu1 %vm165_vm0, %v159_v11 }
  0x19   : > { %487 = vmatmul.mubr.msk.f32.gmra.mxu0 %vm165_vm0, %v152_v12  ;;  %499 = vmatmul.mubr.msk.f32.gmra.mxu1 %vm165_vm0, %v160_v13 }
  0x1a   : > { %489 = vmatprep.mubr.msk.f32.mxu0 %vm165_vm0, %v153_v14  ;;  %501 = vmatprep.mubr.msk.f32.mxu1 %vm165_vm0, %v161_v15 }
  0x1d   : > { %490 = vmatmul.mubr.msk.f32.gmra.mxu0 %vm165_vm0, %v154_v16  ;;  %502 = vmatmul.mubr.msk.f32.gmra.mxu1 %vm165_vm0, %v162_v17 }
  0xd1   : > { %v482_v18 = vpop.f32.mrf.mxu0  ;;  %v494_v19 = vpop.f32.mrf.mxu1 }
  0xd2   : > { %360 = vst [vmem:[%s582_s22 + $0x8] sm:$0xff] %v482_v18  ;;  %368 = vst [vmem:[%s582_s22 + $0x48] sm:$0xff] %v494_v19 }
  0xd3   : > { %v280_v20 = vpop.f32.mrf.mxu0  ;;  %v320_v21 = vpop.f32.mrf.mxu1 }
  0xd4   : > { %359 = vst [vmem:[%s582_s22] sm:$0xff] %v280_v20  ;;  %367 = vst [vmem:[%s582_s22 + $0x40] sm:$0xff] %v320_v21 }
  0xd5   : > { %v485_v22 = vpop.f32.mrf.mxu0  ;;  %v497_v23 = vpop.f32.mrf.mxu1 }
  0xd6   : > { %362 = vst [vmem:[%s582_s22 + $0x18] sm:$0xff] %v485_v22  ;;  %370 = vst [vmem:[%s582_s22 + $0x58] sm:$0xff] %v497_v23 }
  0xd7   : > { %v290_v24 = vpop.f32.mrf.mxu0  ;;  %v330_v25 = vpop.f32.mrf.mxu1 }
  0xd8   : > { %361 = vst [vmem:[%s582_s22 + $0x10] sm:$0xff] %v290_v24  ;;  %369 = vst [vmem:[%s582_s22 + $0x50] sm:$0xff] %v330_v25 }
  0xd9   : > { %v488_v26 = vpop.f32.mrf.mxu0  ;;  %v500_v27 = vpop.f32.mrf.mxu1 }
  0xda   : > { %364 = vst [vmem:[%s582_s22 + $0x28] sm:$0xff] %v488_v26  ;;  %372 = vst [vmem:[%s582_s22 + $0x68] sm:$0xff] %v500_v27 }
  0xdb   : > { %v300_v28 = vpop.f32.mrf.mxu0  ;;  %v340_v29 = vpop.f32.mrf.mxu1 }
  0xdc   : > { %363 = vst [vmem:[%s582_s22 + $0x20] sm:$0xff] %v300_v28  ;;  %371 = vst [vmem:[%s582_s22 + $0x60] sm:$0xff] %v340_v29 }
  0xdd   : > { %v491_v30 = vpop.f32.mrf.mxu0  ;;  %v503_v31 = vpop.f32.mrf.mxu1 }
  0xde   : > { %366 = vst [vmem:[%s582_s22 + $0x38] sm:$0xff] %v491_v30  ;;  %374 = vst [vmem:[%s582_s22 + $0x78] sm:$0xff] %v503_v31 }
  0xdf   : > { %v310_v32 = vpop.f32.mrf.mxu0  ;;  %v350_v33 = vpop.f32.mrf.mxu1 }
  0xe0   : > { %365 = vst [vmem:[%s582_s22 + $0x30] sm:$0xff] %v310_v32  ;;  %373 = vst [vmem:[%s582_s22 + $0x70] sm:$0xff] %v350_v33 }
  0xe1 PF: > { %s12_s9 = sadd.s32 1, %s522_s9  }
  0xe2   : > { %p9_p4 = scmp.ge.s32.totalorder %s12_s9, 4  }
  0xe4   :  { %11 = sbr.rel (!%p9_p4) target bundleno = 1 (0x1), region = 58 }

// kernel: gcn_forward.5
= control target key start
LH: loop header
LB: loop body
LE: loop exit
PB: predicated region body
PF: predicated region fallthrough
CT: control target
= control target key end

     0   :  { %s989_s12 = smov 0   ;;  %s991_s13 = smov 0   ;;  %s1158_s0 = inlined_call_operand.vmem [shape: f32[256,256], index: 0, kind: input, shape index: {}]   ;;  %s1159_s1 = inlined_call_operand.vmem [shape: f32[256,128], index: 1, kind: input, shape index: {}]   ;;  %s1160_s2 = inlined_call_operand.vmem [shape: f32[1,128], index: 2, kind: input, shape index: {}]   ;;  %s1161_s3 = inlined_call_operand.vmem [shape: f32[256,128], index: 3, kind: output, shape index: {}]  }
   0x1   :  { %s993_s14 = smov 0   ;;  %s995_s15 = smov 0  }
   0x2   :  { %s997_s16 = smov 0   ;;  %s999_s17 = smov 0  }
   0x3   :  { %s1001_s18 = smov 0  }
   0x4 LB: > { %s22_s19 = sadd.s32 1, %s958_s16  ;;  %s25_s20 = sadd.s32 1, %s962_s17  ;;  %s966_s18 = sphi %s1001_s18, %s13_s18   ;;  %s962_s17 = sphi %s999_s17, %s1167_s17   ;;  %s958_s16 = sphi %s997_s16, %s1166_s16   ;;  %s954_s15 = sphi %s995_s15, %s1165_s15   ;;  %s950_s14 = sphi %s993_s14, %s1164_s14   ;;  %s946_s13 = sphi %s991_s13, %s1163_s13   ;;  %s942_s12 = sphi %s989_s12, %s1162_s12  }
   0x5   : > { %p23_p0 = scmp.ge.s32.totalorder %s22_s19, 2  ;;  %p41_p1 = scmp.ne.s32.totalorder %s946_s13, %s942_s12 }
   0x6   : > { %p42_p2 = scmp.eq.s32.totalorder %s966_s18, 0  ;;  %s34_s24 = sadd.s32 1, %s946_s13 }
   0x7   : > { %s1169_s19 = smov (%p23_p0, %s22_s19), 0  ;;  %s1171_s20 = smov (!%p23_p0, %s25_s20), %s962_s17 }
   0x8   : > { %p43_p3 = por %p42_p2, %p41_p1  ;;  %p27_p4 = scmp.ge.s32.totalorder %s1171_s20, 2 }
   0x9   : > { %s30_s21 = ssub.s32 %s958_s16, %s1169_s19  ;;  %p718_p6 = scmp.ge.s32.totalorder %s966_s18, 4 }
   0xa   : > { %s1173_s20 = smov (%p27_p4, %s1171_s20), 0 }
   0xb   : > { %s29_s22 = ssub.s32 %s962_s17, %s1173_s20  ;;  %143 = sbr.rel (%p718_p6) target bundleno = 30 (0x1e), region = 20 }
   0xc   : > { %s31_s23 = sor.u32 %s30_s21, %s29_s22 }
   0xd   : > { %p32_p5 = scmp.eq.s32.totalorder %s31_s23, 0 }
   0xf   : > { %s1040_s25 = scalar_select %p32_p5, %s946_s13, %s34_s24  }
  0x10   : > { %146 = sbr.rel (!%p43_p3) target bundleno = 30 (0x1e), region = 24  ;;  %s148_s26 = sand.u32 (%p43_p3), 1, %s946_s13  }
  0x11   : > { %s734_s27 = sshll.u32 (%p43_p3), %s962_s17, 5  ;;  %s719_s28 = sshll.u32 (%p43_p3), %s148_s26, 7 }
  0x12   : > { %s153_s29 = sadd.s32 (%p43_p3), %s958_s16, %s734_s27  ;;  %s150_s7 = scalar_lea.vmem (%p43_p3), [#allocation3], %s719_s28 }
  0x13   : > { %s722_s30 = sshll.u32 (%p43_p3), %s153_s29, 3 }
  0x14   : > { %s1049_s6 = scalar_lea.vmem (%p43_p3), %s1158_s0, %s722_s30 }
  0x15   : > { %v214_v0 = vld [vmem:[%s1049_s6] sm:$0xff]  ;;  %v216_v1 = vld [vmem:[%s1049_s6 + $0x10] sm:$0xff] }
  0x16   : > { %v218_v2 = vld [vmem:[%s1049_s6 + $0x20] sm:$0xff]  ;;  %215 = vst [vmem:[%s150_s7] sm:$0xff] %v214_v0  ;;  %217 = vst [vmem:[%s150_s7 + $0x8] sm:$0xff] %v216_v1  ;;  %v220_v3 = vld [vmem:[%s1049_s6 + $0x30] sm:$0xff] }
  0x17   : > { %219 = vst [vmem:[%s150_s7 + $0x10] sm:$0xff] %v218_v2  ;;  %v222_v4 = vld [vmem:[%s1049_s6 + $0x40] sm:$0xff]  ;;  %v224_v5 = vld [vmem:[%s1049_s6 + $0x50] sm:$0xff]  ;;  %221 = vst [vmem:[%s150_s7 + $0x18] sm:$0xff] %v220_v3 }
  0x18   : > { %223 = vst [vmem:[%s150_s7 + $0x20] sm:$0xff] %v222_v4  ;;  %225 = vst [vmem:[%s150_s7 + $0x28] sm:$0xff] %v224_v5  ;;  %v226_v6 = vld [vmem:[%s1049_s6 + $0x60] sm:$0xff]  ;;  %v228_v7 = vld [vmem:[%s1049_s6 + $0x70] sm:$0xff] }
  0x19   : > { %v230_v8 = vld [vmem:[%s1049_s6 + $0x80] sm:$0xff]  ;;  %227 = vst [vmem:[%s150_s7 + $0x30] sm:$0xff] %v226_v6  ;;  %229 = vst [vmem:[%s150_s7 + $0x38] sm:$0xff] %v228_v7  ;;  %v232_v9 = vld [vmem:[%s1049_s6 + $0x90] sm:$0xff] }
  0x1a   : > { %231 = vst [vmem:[%s150_s7 + $0x40] sm:$0xff] %v230_v8  ;;  %v234_v10 = vld [vmem:[%s1049_s6 + $0xa0] sm:$0xff]  ;;  %v236_v11 = vld [vmem:[%s1049_s6 + $0xb0] sm:$0xff]  ;;  %233 = vst [vmem:[%s150_s7 + $0x48] sm:$0xff] %v232_v9 }
  0x1b   : > { %235 = vst [vmem:[%s150_s7 + $0x50] sm:$0xff] %v234_v10  ;;  %237 = vst [vmem:[%s150_s7 + $0x58] sm:$0xff] %v236_v11  ;;  %v238_v12 = vld [vmem:[%s1049_s6 + $0xc0] sm:$0xff]  ;;  %v240_v13 = vld [vmem:[%s1049_s6 + $0xd0] sm:$0xff] }
  0x1c   : > { %v242_v14 = vld [vmem:[%s1049_s6 + $0xe0] sm:$0xff]  ;;  %239 = vst [vmem:[%s150_s7 + $0x60] sm:$0xff] %v238_v12  ;;  %241 = vst [vmem:[%s150_s7 + $0x68] sm:$0xff] %v240_v13  ;;  %v244_v15 = vld [vmem:[%s1049_s6 + $0xf0] sm:$0xff] }
  0x1d   : > { %243 = vst [vmem:[%s150_s7 + $0x70] sm:$0xff] %v242_v14  ;;  %245 = vst [vmem:[%s150_s7 + $0x78] sm:$0xff] %v244_v15 }
  0x1e PF: > { %p723_p7 = scmp.ge.s32.totalorder %s966_s18, 1  ;;  %p259_p8 = scmp.lt.s32.totalorder %s966_s18, 5 }
  0x20   : > { %p260_p9 = pnand %p723_p7, %p259_p8 }
  0x21   : > { %s266_s8 = sand.u32 (!%p260_p9), 1, %s942_s12   ;;  %s725_s9 = sshll.u32 (!%p260_p9), %s950_s14, 4 }
  0x22   : > { %263 = sbr.rel (%p260_p9) target bundleno = 313 (0x139), region = 66  ;;  %s724_s10 = sshll.u32 (!%p260_p9), %s266_s8, 7 }
  0x23   : > { %p296_p10 = scmp.lt.s32.totalorder (!%p260_p9), %s725_s9, 31  ;;  %s727_s11 = sshll.u32 (!%p260_p9), %s954_s15, 4 }
  0x24   : > { %p302_p11 = scmp.lt.s32.totalorder (!%p260_p9), %s727_s11, 31  ;;  %s1082_s12 = scalar_lea.vmem (!%p260_p9), [#allocation3], %s724_s10 }
  0x25   : > { %p729_p12 = scmp.ne.s32.totalorder (!%p260_p9), %s950_s14, 0 }
  0x27   : > { %s1175_s9 = smov (!%p296_p10, %s725_s9), 31  ;;  %s1177_s11 = smov (!%p302_p11, %s727_s11), 31 }
  0x28   : > { %s726_s21 = sshll.u32 %s1175_s9, 3  ;;  %s728_s26 = sshll.u32 %s1177_s11, 3 }
  0x29   : > { %s1075_s24 = scalar_lea.vmem %s1159_s1, %s726_s21  ;;  %s1080_s29 = scalar_lea.vmem %s1161_s3, %s728_s26 }
  0x2a   : > { %310 = sbr.rel (%p729_p12) target bundleno = 56 (0x38), region = 74 }
  0x2f   : > { %v968_v16 = vmov 0.0  }
  0x30   : > { %311 = vst [vmem:[#allocation2 + $0x30] sm:$0xff] %v968_v16  ;;  %312 = vst [vmem:[#allocation2] sm:$0xff] %v968_v16 }
  0x31   : > { %313 = vst [vmem:[#allocation2 + $0x58] sm:$0xff] %v968_v16  ;;  %314 = vst [vmem:[#allocation2 + $0x18] sm:$0xff] %v968_v16 }
  0x32   : > { %315 = vst [vmem:[#allocation2 + $0x50] sm:$0xff] %v968_v16  ;;  %316 = vst [vmem:[#allocation2 + $0x68] sm:$0xff] %v968_v16 }
  0x33   : > { %317 = vst [vmem:[#allocation2 + $0x8] sm:$0xff] %v968_v16  ;;  %318 = vst [vmem:[#allocation2 + $0x48] sm:$0xff] %v968_v16 }
  0x34   : > { %319 = vst [vmem:[#allocation2 + $0x40] sm:$0xff] %v968_v16  ;;  %320 = vst [vmem:[#allocation2 + $0x20] sm:$0xff] %v968_v16 }
  0x35   : > { %321 = vst [vmem:[#allocation2 + $0x10] sm:$0xff] %v968_v16  ;;  %322 = vst [vmem:[#allocation2 + $0x38] sm:$0xff] %v968_v16 }
  0x36   : > { %323 = vst [vmem:[#allocation2 + $0x60] sm:$0xff] %v968_v16  ;;  %324 = vst [vmem:[#allocation2 + $0x70] sm:$0xff] %v968_v16 }
  0x37   : > { %325 = vst [vmem:[#allocation2 + $0x78] sm:$0xff] %v968_v16  ;;  %326 = vst [vmem:[#allocation2 + $0x28] sm:$0xff] %v968_v16 }
  0x38 PF: > { %v374_v17 = vld [vmem:[%s1075_s24 + $0x78] sm:$0xff]  ;;  %v373_v18 = vld [vmem:[%s1075_s24 + $0x70] sm:$0xff]  ;;  %v372_v19 = vld [vmem:[%s1075_s24 + $0x68] sm:$0xff]  ;;  %p730_p13 = scmp.ne.s32.totalorder %s950_s14, 1 }
  0x39   : > { %767 = vmatprep.subr.mxu0 %v374_v17  ;;  %823 = vmatprep.subr.mxu1 %v374_v17  ;;  %v371_v20 = vld [vmem:[%s1075_s24 + $0x60] sm:$0xff]  ;;  %v370_v21 = vld [vmem:[%s1075_s24 + $0x58] sm:$0xff]  ;;  %v369_v22 = vld [vmem:[%s1075_s24 + $0x50] sm:$0xff] }
  0x3a   : > { %768 = vmatpush3.msra.mxu0 %v374_v17  ;;  %839 = vmatpush3.msra.mxu1 %v374_v17  ;;  %v368_v23 = vld [vmem:[%s1075_s24 + $0x48] sm:$0xff]  ;;  %v367_v24 = vld [vmem:[%s1075_s24 + $0x40] sm:$0xff]  ;;  %v366_v25 = vld [vmem:[%s1075_s24 + $0x38] sm:$0xff] }
  0x3b   : > { %769 = vmatprep.subr.mxu0 %v373_v18  ;;  %824 = vmatprep.subr.mxu1 %v373_v18  ;;  %v365_v26 = vld [vmem:[%s1075_s24 + $0x30] sm:$0xff]  ;;  %v364_v27 = vld [vmem:[%s1075_s24 + $0x28] sm:$0xff]  ;;  %v363_v28 = vld [vmem:[%s1075_s24 + $0x20] sm:$0xff] }
  0x3c   : > { %770 = vmatpush3.msra.mxu0 %v373_v18  ;;  %840 = vmatpush3.msra.mxu1 %v373_v18  ;;  %v362_v29 = vld [vmem:[%s1075_s24 + $0x18] sm:$0xff]  ;;  %v361_v30 = vld [vmem:[%s1075_s24 + $0x10] sm:$0xff]  ;;  %v360_v31 = vld [vmem:[%s1075_s24 + $0x8] sm:$0xff] }
  0x3d   : > { %771 = vmatprep.subr.mxu0 %v372_v19  ;;  %825 = vmatprep.subr.mxu1 %v372_v19  ;;  %v359_v32 = vld [vmem:[%s1075_s24] sm:$0xff]  ;;  %v344_v35 = vld [vmem:[%s1082_s12 + $0x8] sm:$0xff]  ;;  %v345_v37 = vld [vmem:[%s1082_s12 + $0x10] sm:$0xff] }
  0x3e   : > { %772 = vmatpush3.msra.mxu0 %v372_v19  ;;  %841 = vmatpush3.msra.mxu1 %v372_v19  ;;  %v343_v33 = vld [vmem:[%s1082_s12] sm:$0xff]  ;;  %v352_v36 = vld [vmem:[%s1082_s12 + $0x48] sm:$0xff]  ;;  %v353_v38 = vld [vmem:[%s1082_s12 + $0x50] sm:$0xff] }
  0x3f   : > { %773 = vmatprep.subr.mxu0 %v371_v20  ;;  %826 = vmatprep.subr.mxu1 %v371_v20  ;;  %v351_v34 = vld [vmem:[%s1082_s12 + $0x40] sm:$0xff]  ;;  %v346_v39 = vld [vmem:[%s1082_s12 + $0x18] sm:$0xff]  ;;  %v348_v43 = vld [vmem:[%s1082_s12 + $0x28] sm:$0xff] }
  0x40   : > { %774 = vmatpush3.msra.mxu0 %v371_v20  ;;  %842 = vmatpush3.msra.mxu1 %v371_v20  ;;  %v354_v40 = vld [vmem:[%s1082_s12 + $0x58] sm:$0xff]  ;;  %v347_v41 = vld [vmem:[%s1082_s12 + $0x20] sm:$0xff]  ;;  %v356_v44 = vld [vmem:[%s1082_s12 + $0x68] sm:$0xff] }
  0x41   : > { %775 = vmatprep.subr.mxu0 %v370_v21  ;;  %827 = vmatprep.subr.mxu1 %v370_v21  ;;  %v355_v42 = vld [vmem:[%s1082_s12 + $0x60] sm:$0xff]  ;;  %v349_v45 = vld [vmem:[%s1082_s12 + $0x30] sm:$0xff]  ;;  %v350_v47 = vld [vmem:[%s1082_s12 + $0x38] sm:$0xff] }
  0x42   : > { %776 = vmatpush3.msra.mxu0 %v370_v21  ;;  %843 = vmatpush3.msra.mxu1 %v370_v21  ;;  %v357_v46 = vld [vmem:[%s1082_s12 + $0x70] sm:$0xff]  ;;  %v358_v48 = vld [vmem:[%s1082_s12 + $0x78] sm:$0xff]  ;;  %v328_v49 = vld [vmem:[#allocation2] sm:$0xff] }
  0x43   : > { %777 = vmatprep.subr.mxu0 %v369_v22  ;;  %828 = vmatprep.subr.mxu1 %v369_v22  ;;  %v336_v50 = vld [vmem:[#allocation2 + $0x20] sm:$0xff]  ;;  %v327_v53 = vld [vmem:[#allocation2 + $0x30] sm:$0xff]  ;;  %v330_v59 = vld [vmem:[#allocation2 + $0x18] sm:$0xff] }
  0x44   : > { %778 = vmatpush3.msra.mxu0 %v369_v22  ;;  %844 = vmatpush3.msra.mxu1 %v369_v22  ;;  %v335_v54 = vld [vmem:[#allocation2 + $0x40] sm:$0xff]  ;;  %v338_v60 = vld [vmem:[#allocation2 + $0x38] sm:$0xff]  ;;  %v337_v2 = vld [vmem:[#allocation2 + $0x10] sm:$0xff] }
  0x45   : > { %779 = vmatprep.subr.mxu0 %v368_v23  ;;  %829 = vmatprep.subr.mxu1 %v368_v23  ;;  %v329_v1 = vld [vmem:[#allocation2 + $0x58] sm:$0xff]  ;;  %v332_v7 = vld [vmem:[#allocation2 + $0x68] sm:$0xff]  ;;  %v340_v8 = vld [vmem:[#allocation2 + $0x70] sm:$0xff] }
  0x46   : > { %780 = vmatpush3.msra.mxu0 %v368_v23  ;;  %845 = vmatpush3.msra.mxu1 %v368_v23  ;;  %v331_v13 = vld [vmem:[#allocation2 + $0x50] sm:$0xff]  ;;  %v339_v14 = vld [vmem:[#allocation2 + $0x60] sm:$0xff]  ;;  %v334_v19 = vld [vmem:[#allocation2 + $0x48] sm:$0xff] }
  0x47   : > { %781 = vmatprep.subr.mxu0 %v367_v24  ;;  %830 = vmatprep.subr.mxu1 %v367_v24  ;;  %v342_v20 = vld [vmem:[#allocation2 + $0x28] sm:$0xff] }
  0x48   : > { %782 = vmatpush3.msra.mxu0 %v367_v24  ;;  %846 = vmatpush3.msra.mxu1 %v367_v24 }
  0x49   : > { %783 = vmatprep.subr.mxu0 %v366_v25  ;;  %831 = vmatprep.subr.mxu1 %v366_v25 }
  0x4a   : > { %784 = vmatpush3.msra.mxu0 %v366_v25  ;;  %847 = vmatpush3.msra.mxu1 %v366_v25  ;;  %v333_v25 = vld [vmem:[#allocation2 + $0x8] sm:$0xff] }
  0x4b   : > { %785 = vmatprep.subr.mxu0 %v365_v26  ;;  %832 = vmatprep.subr.mxu1 %v365_v26 }
  0x4c   : > { %786 = vmatpush3.msra.mxu0 %v365_v26  ;;  %848 = vmatpush3.msra.mxu1 %v365_v26  ;;  %v341_v26 = vld [vmem:[#allocation2 + $0x78] sm:$0xff] }
  0x4d   : > { %787 = vmatprep.subr.mxu0 %v364_v27  ;;  %833 = vmatprep.subr.mxu1 %v364_v27 }
  0x4e   : > { %788 = vmatpush3.msra.mxu0 %v364_v27  ;;  %849 = vmatpush3.msra.mxu1 %v364_v27 }
  0x4f   : > { %789 = vmatprep.subr.mxu0 %v363_v28  ;;  %834 = vmatprep.subr.mxu1 %v363_v28 }
  0x50   : > { %790 = vmatpush3.msra.mxu0 %v363_v28  ;;  %850 = vmatpush3.msra.mxu1 %v363_v28 }
  0x51   : > { %791 = vmatprep.subr.mxu0 %v362_v29  ;;  %835 = vmatprep.subr.mxu1 %v362_v29 }
  0x52   : > { %792 = vmatpush3.msra.mxu0 %v362_v29  ;;  %851 = vmatpush3.msra.mxu1 %v362_v29 }
  0x53   : > { %793 = vmatprep.subr.mxu0 %v361_v30  ;;  %836 = vmatprep.subr.mxu1 %v361_v30 }
  0x54   : > { %794 = vmatpush3.msra.mxu0 %v361_v30  ;;  %852 = vmatpush3.msra.mxu1 %v361_v30 }
  0x55   : > { %795 = vmatprep.subr.mxu0 %v360_v31  ;;  %837 = vmatprep.subr.mxu1 %v360_v31 }
  0x56   : > { %796 = vmatpush3.msra.mxu0 %v360_v31  ;;  %853 = vmatpush3.msra.mxu1 %v360_v31 }
  0x57   : > { %797 = vmatprep.subr.mxu0 %v359_v32  ;;  %838 = vmatprep.subr.mxu1 %v359_v32 }
  0x58   : > { %798 = vmatpush3.msra.mxu0 %v359_v32  ;;  %854 = vmatpush3.msra.mxu1 %v359_v32 }
  0x59   : > { %799 = vmatprep.mubr.f32.mxu0 %v343_v33  ;;  %811 = vmatprep.mubr.f32.mxu1 %v351_v34 }
  0x5a   : > { %800 = vmatmul.mubr.f32.vlgmr.msra.gmra.mxu0 %v344_v35  ;;  %812 = vmatmul.mubr.f32.vlgmr.msra.gmra.mxu1 %v352_v36 }
  0x5b   : > { %802 = vmatprep.mubr.f32.mxu0 %v345_v37  ;;  %814 = vmatprep.mubr.f32.mxu1 %v353_v38 }
  0x5e   : > { %803 = vmatmul.mubr.f32.gmra.mxu0 %v346_v39  ;;  %815 = vmatmul.mubr.f32.gmra.mxu1 %v354_v40 }
  0x5f   : > { %805 = vmatprep.mubr.f32.mxu0 %v347_v41  ;;  %817 = vmatprep.mubr.f32.mxu1 %v355_v42 }
  0x62   : > { %806 = vmatmul.mubr.f32.gmra.mxu0 %v348_v43  ;;  %818 = vmatmul.mubr.f32.gmra.mxu1 %v356_v44 }
  0x63   : > { %808 = vmatprep.mubr.f32.mxu0 %v349_v45  ;;  %820 = vmatprep.mubr.f32.mxu1 %v357_v46 }
  0x66   : > { %809 = vmatmul.mubr.f32.gmra.mxu0 %v350_v47  ;;  %821 = vmatmul.mubr.f32.gmra.mxu1 %v358_v48 }
 0x11a   : > { %v801_v51 = vpop.f32.mrf.mxu0  ;;  %v813_v52 = vpop.f32.mrf.mxu1 }
 0x11b   : > { %v521_v55 = vadd.f32 %v801_v51, %v328_v49  ;;  %v529_v56 = vadd.f32 %v813_v52, %v336_v50 }
 0x11c   : > { %v441_v57 = vpop.f32.mrf.mxu0  ;;  %v481_v58 = vpop.f32.mrf.mxu1 }
 0x11d   : > { %537 = vst [vmem:[#allocation2] sm:$0xff] %v521_v55  ;;  %545 = vst [vmem:[#allocation2 + $0x20] sm:$0xff] %v529_v56  ;;  %v520_v61 = vadd.f32 %v441_v57, %v327_v53  ;;  %v528_v62 = vadd.f32 %v481_v58, %v335_v54 }
 0x11e   : > { %v804_v63 = vpop.f32.mrf.mxu0  ;;  %v816_v0 = vpop.f32.mrf.mxu1 }
 0x11f   : > { %536 = vst [vmem:[#allocation2 + $0x30] sm:$0xff] %v520_v61  ;;  %544 = vst [vmem:[#allocation2 + $0x40] sm:$0xff] %v528_v62  ;;  %v523_v3 = vadd.f32 %v804_v63, %v330_v59  ;;  %v531_v4 = vadd.f32 %v816_v0, %v338_v60 }
 0x120   : > { %v451_v5 = vpop.f32.mrf.mxu0  ;;  %v491_v6 = vpop.f32.mrf.mxu1 }
 0x121   : > { %539 = vst [vmem:[#allocation2 + $0x18] sm:$0xff] %v523_v3  ;;  %547 = vst [vmem:[#allocation2 + $0x38] sm:$0xff] %v531_v4  ;;  %v522_v9 = vadd.f32 %v451_v5, %v329_v1  ;;  %v530_v10 = vadd.f32 %v491_v6, %v337_v2 }
 0x122   : > { %v807_v11 = vpop.f32.mrf.mxu0  ;;  %v819_v12 = vpop.f32.mrf.mxu1 }
 0x123   : > { %538 = vst [vmem:[#allocation2 + $0x58] sm:$0xff] %v522_v9  ;;  %546 = vst [vmem:[#allocation2 + $0x10] sm:$0xff] %v530_v10  ;;  %v525_v15 = vadd.f32 %v807_v11, %v332_v7  ;;  %v533_v16 = vadd.f32 %v819_v12, %v340_v8 }
 0x124   : > { %v461_v17 = vpop.f32.mrf.mxu0  ;;  %v501_v18 = vpop.f32.mrf.mxu1 }
 0x125   : > { %541 = vst [vmem:[#allocation2 + $0x68] sm:$0xff] %v525_v15  ;;  %549 = vst [vmem:[#allocation2 + $0x70] sm:$0xff] %v533_v16  ;;  %v524_v21 = vadd.f32 %v461_v17, %v331_v13  ;;  %v532_v22 = vadd.f32 %v501_v18, %v339_v14 }
 0x126   : > { %v810_v23 = vpop.f32.mrf.mxu0  ;;  %v822_v24 = vpop.f32.mrf.mxu1 }
 0x127   : > { %540 = vst [vmem:[#allocation2 + $0x50] sm:$0xff] %v524_v21  ;;  %548 = vst [vmem:[#allocation2 + $0x60] sm:$0xff] %v532_v22  ;;  %v527_v27 = vadd.f32 %v810_v23, %v334_v19  ;;  %v535_v28 = vadd.f32 %v822_v24, %v342_v20  ;;  %555 = sbr.rel (%p730_p13) target bundleno = 313 (0x139), region = 78 }
 0x128   : > { %v471_v29 = vpop.f32.mrf.mxu0  ;;  %v511_v30 = vpop.f32.mrf.mxu1 }
 0x129   : > { %543 = vst [vmem:[#allocation2 + $0x48] sm:$0xff] %v527_v27  ;;  %551 = vst [vmem:[#allocation2 + $0x28] sm:$0xff] %v535_v28  ;;  %v526_v31 = vadd.f32 %v471_v29, %v333_v25  ;;  %v534_v32 = vadd.f32 %v511_v30, %v341_v26 }
 0x12b   : > { %542 = vst [vmem:[#allocation2 + $0x8] sm:$0xff] %v526_v31  ;;  %550 = vst [vmem:[#allocation2 + $0x78] sm:$0xff] %v534_v32 }
 0x12c   : > { %v556_v33 = vld [vmem:[#allocation2 + $0x30] sm:$0xff]  ;;  %v731_v34 = vld [vmem:[%s1160_s2] ss:$0 sm:$0xff]  ;;  %v558_v38 = vld [vmem:[#allocation2 + $0x58] sm:$0xff] }
 0x12d   : > { %v557_v35 = vld [vmem:[#allocation2] sm:$0xff]  ;;  %v579_v36 = vadd.f32 %v731_v34, %v556_v33  ;;  %v559_v39 = vld [vmem:[#allocation2 + $0x18] sm:$0xff]  ;;  %v581_v41 = vadd.f32 %v731_v34, %v558_v38  ;;  %v561_v44 = vld [vmem:[#allocation2 + $0x68] sm:$0xff] }
 0x12e   : > { %v580_v37 = vadd.f32 %v731_v34, %v557_v35  ;;  %v560_v40 = vld [vmem:[#allocation2 + $0x50] sm:$0xff]  ;;  %v582_v42 = vadd.f32 %v731_v34, %v559_v39  ;;  %v584_v49 = vadd.f32 %v731_v34, %v561_v44  ;;  %v564_v51 = vld [vmem:[#allocation2 + $0x40] sm:$0xff]  ;;  %v567_v58 = vld [vmem:[#allocation2 + $0x38] sm:$0xff] }
 0x12f   : > { %v583_v43 = vadd.f32 %v731_v34, %v560_v40  ;;  %v595_v47 = vmax.f32 %v579_v36, 0.0  ;;  %v565_v52 = vld [vmem:[#allocation2 + $0x20] sm:$0xff]  ;;  %v566_v53 = vld [vmem:[#allocation2 + $0x10] sm:$0xff]  ;;  %v597_v54 = vmax.f32 %v581_v41, 0.0  ;;  %v587_v63 = vadd.f32 %v731_v34, %v564_v51 }
 0x130   : > { %v563_v46 = vld [vmem:[#allocation2 + $0x48] sm:$0xff]  ;;  %v596_v48 = vmax.f32 %v580_v37, 0.0  ;;  %v598_v55 = vmax.f32 %v582_v42, 0.0  ;;  %v568_v59 = vld [vmem:[#allocation2 + $0x60] sm:$0xff]  ;;  %v569_v60 = vld [vmem:[#allocation2 + $0x70] sm:$0xff]  ;;  %v600_v61 = vmax.f32 %v584_v49, 0.0  ;;  %v588_v0 = vadd.f32 %v731_v34, %v565_v52 }
 0x131   : > { %v599_v56 = vmax.f32 %v583_v43, 0.0  ;;  %v586_v57 = vadd.f32 %v731_v34, %v563_v46  ;;  %611 = vst [vmem:[%s1080_s29] sm:$0xff] %v595_v47  ;;  %v571_v2 = vld [vmem:[#allocation2 + $0x28] sm:$0xff]  ;;  %613 = vst [vmem:[%s1080_s29 + $0x10] sm:$0xff] %v597_v54  ;;  %v589_v4 = vadd.f32 %v731_v34, %v566_v53  ;;  %v590_v5 = vadd.f32 %v731_v34, %v567_v58 }
 0x132   : > { %v562_v45 = vld [vmem:[#allocation2 + $0x8] sm:$0xff]  ;;  %612 = vst [vmem:[%s1080_s29 + $0x8] sm:$0xff] %v596_v48  ;;  %v570_v1 = vld [vmem:[#allocation2 + $0x78] sm:$0xff]  ;;  %614 = vst [vmem:[%s1080_s29 + $0x18] sm:$0xff] %v598_v55  ;;  %v591_v6 = vadd.f32 %v731_v34, %v568_v59  ;;  %v603_v7 = vmax.f32 %v587_v63, 0.0  ;;  %v604_v8 = vmax.f32 %v588_v0, 0.0  ;;  %v592_v9 = vadd.f32 %v731_v34, %v569_v60 }
 0x133   : > { %v585_v50 = vadd.f32 %v731_v34, %v562_v45  ;;  %615 = vst [vmem:[%s1080_s29 + $0x20] sm:$0xff] %v599_v56  ;;  %v602_v3 = vmax.f32 %v586_v57, 0.0  ;;  %616 = vst [vmem:[%s1080_s29 + $0x28] sm:$0xff] %v600_v61  ;;  %v593_v10 = vadd.f32 %v731_v34, %v570_v1  ;;  %v605_v11 = vmax.f32 %v589_v4, 0.0 }
 0x134   : > { %v606_v12 = vmax.f32 %v590_v5, 0.0  ;;  %v607_v13 = vmax.f32 %v591_v6, 0.0  ;;  %v594_v14 = vadd.f32 %v731_v34, %v571_v2  ;;  %619 = vst [vmem:[%s1080_s29 + $0x40] sm:$0xff] %v603_v7  ;;  %620 = vst [vmem:[%s1080_s29 + $0x48] sm:$0xff] %v604_v8  ;;  %v608_v15 = vmax.f32 %v592_v9, 0.0 }
 0x135   : > { %v601_v62 = vmax.f32 %v585_v50, 0.0  ;;  %618 = vst [vmem:[%s1080_s29 + $0x38] sm:$0xff] %v602_v3  ;;  %v609_v16 = vmax.f32 %v593_v10, 0.0  ;;  %621 = vst [vmem:[%s1080_s29 + $0x50] sm:$0xff] %v605_v11 }
 0x136   : > { %622 = vst [vmem:[%s1080_s29 + $0x58] sm:$0xff] %v606_v12  ;;  %623 = vst [vmem:[%s1080_s29 + $0x60] sm:$0xff] %v607_v13  ;;  %v610_v17 = vmax.f32 %v594_v14, 0.0 }
 0x137   : > { %617 = vst [vmem:[%s1080_s29 + $0x30] sm:$0xff] %v601_v62  ;;  %624 = vst [vmem:[%s1080_s29 + $0x68] sm:$0xff] %v608_v15 }
 0x138   : > { %625 = vst [vmem:[%s1080_s29 + $0x70] sm:$0xff] %v609_v16  ;;  %626 = vst [vmem:[%s1080_s29 + $0x78] sm:$0xff] %v610_v17 }
 0x139 PF: > { %s13_s18 = sadd.s32 1, %s966_s18   ;;  %s1162_s12 = smov %s946_s13 }
 0x13a   : > { %p10_p0 = scmp.ge.s32.totalorder %s13_s18, 6   ;;  %s1163_s13 = smov %s1040_s25 }
 0x13b   : > { %s1164_s14 = smov %s958_s16  ;;  %s1165_s15 = smov %s962_s17 }
 0x13c   : > { %s1166_s16 = smov %s1169_s19  ;;  %s1167_s17 = smov %s1173_s20 }
 0x13d   :  { %12 = sbr.rel (!%p10_p0) target bundleno = 4 (0x4), region = 116 }

// kernel: gcn_forward.7
= control target key start
LH: loop header
LB: loop body
LE: loop exit
PB: predicated region body
PF: predicated region fallthrough
CT: control target
= control target key end

     0   :  { %s1653_s12 = smov 0   ;;  %s1655_s13 = smov 0   ;;  %s2624_s0 = inlined_call_operand.vmem [shape: f32[256,256], index: 0, kind: input, shape index: {}]   ;;  %s2625_s1 = inlined_call_operand.vmem [shape: f32[256,128], index: 1, kind: input, shape index: {}]   ;;  %s2626_s2 = inlined_call_operand.vmem [shape: f32[1,128], index: 2, kind: input, shape index: {}]   ;;  %s2627_s3 = inlined_call_operand.vmem [shape: f32[256,128], index: 3, kind: output, shape index: {}]  }
   0x1   :  { %s1657_s14 = smov 0   ;;  %s1659_s15 = smov 0  }
   0x2   :  { %s1661_s16 = smov 0   ;;  %s1663_s17 = smov 0  }
   0x3   :  { %s1665_s18 = smov 0  }
   0x4 LB: > { %s22_s19 = sadd.s32 1, %s1622_s16  ;;  %s25_s20 = sadd.s32 1, %s1626_s17  ;;  %s1630_s18 = sphi %s1665_s18, %s13_s18   ;;  %s1626_s17 = sphi %s1663_s17, %s2810_s17   ;;  %s1622_s16 = sphi %s1661_s16, %s2809_s16   ;;  %s1618_s15 = sphi %s1659_s15, %s2808_s15   ;;  %s1614_s14 = sphi %s1657_s14, %s2807_s14   ;;  %s1610_s13 = sphi %s1655_s13, %s2806_s13   ;;  %s1606_s12 = sphi %s1653_s12, %s2805_s12  }
   0x5   : > { %p23_p0 = scmp.ge.s32.totalorder %s22_s19, 2  ;;  %p41_p1 = scmp.ne.s32.totalorder %s1610_s13, %s1606_s12 }
   0x6   : > { %p42_p2 = scmp.eq.s32.totalorder %s1630_s18, 0  ;;  %s34_s24 = sadd.s32 1, %s1610_s13 }
   0x7   : > { %s2812_s19 = smov (%p23_p0, %s22_s19), 0  ;;  %s2814_s20 = smov (!%p23_p0, %s25_s20), %s1626_s17 }
   0x8   : > { %p43_p3 = por %p42_p2, %p41_p1  ;;  %p27_p4 = scmp.ge.s32.totalorder %s2814_s20, 2 }
   0x9   : > { %s30_s21 = ssub.s32 %s1622_s16, %s2812_s19  ;;  %p1222_p6 = scmp.ge.s32.totalorder %s1630_s18, 4 }
   0xa   : > { %s2816_s20 = smov (%p27_p4, %s2814_s20), 0 }
   0xb   : > { %s29_s22 = ssub.s32 %s1626_s17, %s2816_s20  ;;  %143 = sbr.rel (%p1222_p6) target bundleno = 30 (0x1e), region = 20 }
   0xc   : > { %s31_s23 = sor.u32 %s30_s21, %s29_s22 }
   0xd   : > { %p32_p5 = scmp.eq.s32.totalorder %s31_s23, 0 }
   0xf   : > { %s1704_s25 = scalar_select %p32_p5, %s1610_s13, %s34_s24  }
  0x10   : > { %146 = sbr.rel (!%p43_p3) target bundleno = 30 (0x1e), region = 24  ;;  %s148_s26 = sand.u32 (%p43_p3), 1, %s1610_s13  }
  0x11   : > { %s1238_s27 = sshll.u32 (%p43_p3), %s1626_s17, 5  ;;  %s1223_s28 = sshll.u32 (%p43_p3), %s148_s26, 7 }
  0x12   : > { %s153_s29 = sadd.s32 (%p43_p3), %s1622_s16, %s1238_s27  ;;  %s150_s7 = scalar_lea.vmem (%p43_p3), [#allocation3], %s1223_s28 }
  0x13   : > { %s1226_s30 = sshll.u32 (%p43_p3), %s153_s29, 3 }
  0x14   : > { %s1713_s6 = scalar_lea.vmem (%p43_p3), %s2624_s0, %s1226_s30 }
  0x15   : > { %v214_v0 = vld [vmem:[%s1713_s6] sm:$0xff]  ;;  %v216_v1 = vld [vmem:[%s1713_s6 + $0x10] sm:$0xff] }
  0x16   : > { %v218_v2 = vld [vmem:[%s1713_s6 + $0x20] sm:$0xff]  ;;  %215 = vst [vmem:[%s150_s7] sm:$0xff] %v214_v0  ;;  %217 = vst [vmem:[%s150_s7 + $0x8] sm:$0xff] %v216_v1  ;;  %v220_v3 = vld [vmem:[%s1713_s6 + $0x30] sm:$0xff] }
  0x17   : > { %219 = vst [vmem:[%s150_s7 + $0x10] sm:$0xff] %v218_v2  ;;  %v222_v4 = vld [vmem:[%s1713_s6 + $0x40] sm:$0xff]  ;;  %v224_v5 = vld [vmem:[%s1713_s6 + $0x50] sm:$0xff]  ;;  %221 = vst [vmem:[%s150_s7 + $0x18] sm:$0xff] %v220_v3 }
  0x18   : > { %223 = vst [vmem:[%s150_s7 + $0x20] sm:$0xff] %v222_v4  ;;  %225 = vst [vmem:[%s150_s7 + $0x28] sm:$0xff] %v224_v5  ;;  %v226_v6 = vld [vmem:[%s1713_s6 + $0x60] sm:$0xff]  ;;  %v228_v7 = vld [vmem:[%s1713_s6 + $0x70] sm:$0xff] }
  0x19   : > { %v230_v8 = vld [vmem:[%s1713_s6 + $0x80] sm:$0xff]  ;;  %227 = vst [vmem:[%s150_s7 + $0x30] sm:$0xff] %v226_v6  ;;  %229 = vst [vmem:[%s150_s7 + $0x38] sm:$0xff] %v228_v7  ;;  %v232_v9 = vld [vmem:[%s1713_s6 + $0x90] sm:$0xff] }
  0x1a   : > { %231 = vst [vmem:[%s150_s7 + $0x40] sm:$0xff] %v230_v8  ;;  %v234_v10 = vld [vmem:[%s1713_s6 + $0xa0] sm:$0xff]  ;;  %v236_v11 = vld [vmem:[%s1713_s6 + $0xb0] sm:$0xff]  ;;  %233 = vst [vmem:[%s150_s7 + $0x48] sm:$0xff] %v232_v9 }
  0x1b   : > { %235 = vst [vmem:[%s150_s7 + $0x50] sm:$0xff] %v234_v10  ;;  %237 = vst [vmem:[%s150_s7 + $0x58] sm:$0xff] %v236_v11  ;;  %v238_v12 = vld [vmem:[%s1713_s6 + $0xc0] sm:$0xff]  ;;  %v240_v13 = vld [vmem:[%s1713_s6 + $0xd0] sm:$0xff] }
  0x1c   : > { %v242_v14 = vld [vmem:[%s1713_s6 + $0xe0] sm:$0xff]  ;;  %239 = vst [vmem:[%s150_s7 + $0x60] sm:$0xff] %v238_v12  ;;  %241 = vst [vmem:[%s150_s7 + $0x68] sm:$0xff] %v240_v13  ;;  %v244_v15 = vld [vmem:[%s1713_s6 + $0xf0] sm:$0xff] }
  0x1d   : > { %243 = vst [vmem:[%s150_s7 + $0x70] sm:$0xff] %v242_v14  ;;  %245 = vst [vmem:[%s150_s7 + $0x78] sm:$0xff] %v244_v15 }
  0x1e PF: > { %p1227_p7 = scmp.ge.s32.totalorder %s1630_s18, 1  ;;  %p259_p8 = scmp.lt.s32.totalorder %s1630_s18, 5 }
  0x20   : > { %p260_p9 = pnand %p1227_p7, %p259_p8 }
  0x21   : > { %s266_s8 = sand.u32 (!%p260_p9), 1, %s1606_s12   ;;  %s1229_s9 = sshll.u32 (!%p260_p9), %s1614_s14, 4 }
  0x22   : > { %263 = sbr.rel (%p260_p9) target bundleno = 736 (0x2e0), region = 66  ;;  %s1228_s10 = sshll.u32 (!%p260_p9), %s266_s8, 7 }
  0x23   : > { %p296_p10 = scmp.lt.s32.totalorder (!%p260_p9), %s1229_s9, 31  ;;  %s1231_s11 = sshll.u32 (!%p260_p9), %s1618_s15, 4 }
  0x24   : > { %p302_p11 = scmp.lt.s32.totalorder (!%p260_p9), %s1231_s11, 31  ;;  %s1746_s12 = scalar_lea.vmem (!%p260_p9), [#allocation3], %s1228_s10 }
  0x25   : > { %p1233_p12 = scmp.ne.s32.totalorder (!%p260_p9), %s1614_s14, 0 }
  0x27   : > { %s2818_s9 = smov (!%p296_p10, %s1229_s9), 31  ;;  %s2820_s11 = smov (!%p302_p11, %s1231_s11), 31 }
  0x28   : > { %s1230_s21 = sshll.u32 %s2818_s9, 3  ;;  %s1232_s26 = sshll.u32 %s2820_s11, 3 }
  0x29   : > { %s1739_s24 = scalar_lea.vmem %s2625_s1, %s1230_s21  ;;  %s1744_s29 = scalar_lea.vmem %s2627_s3, %s1232_s26 }
  0x2a   : > { %310 = sbr.rel (%p1233_p12) target bundleno = 56 (0x38), region = 74 }
  0x2f   : > { %v1632_v16 = vmov 0.0  }
  0x30   : > { %311 = vst [vmem:[#allocation2 + $0x30] sm:$0xff] %v1632_v16  ;;  %312 = vst [vmem:[#allocation2] sm:$0xff] %v1632_v16 }
  0x31   : > { %313 = vst [vmem:[#allocation2 + $0x58] sm:$0xff] %v1632_v16  ;;  %314 = vst [vmem:[#allocation2 + $0x18] sm:$0xff] %v1632_v16 }
  0x32   : > { %315 = vst [vmem:[#allocation2 + $0x50] sm:$0xff] %v1632_v16  ;;  %316 = vst [vmem:[#allocation2 + $0x68] sm:$0xff] %v1632_v16 }
  0x33   : > { %317 = vst [vmem:[#allocation2 + $0x8] sm:$0xff] %v1632_v16  ;;  %318 = vst [vmem:[#allocation2 + $0x48] sm:$0xff] %v1632_v16 }
  0x34   : > { %319 = vst [vmem:[#allocation2 + $0x40] sm:$0xff] %v1632_v16  ;;  %320 = vst [vmem:[#allocation2 + $0x20] sm:$0xff] %v1632_v16 }
  0x35   : > { %321 = vst [vmem:[#allocation2 + $0x10] sm:$0xff] %v1632_v16  ;;  %322 = vst [vmem:[#allocation2 + $0x38] sm:$0xff] %v1632_v16 }
  0x36   : > { %323 = vst [vmem:[#allocation2 + $0x60] sm:$0xff] %v1632_v16  ;;  %324 = vst [vmem:[#allocation2 + $0x70] sm:$0xff] %v1632_v16 }
  0x37   : > { %325 = vst [vmem:[#allocation2 + $0x78] sm:$0xff] %v1632_v16  ;;  %326 = vst [vmem:[#allocation2 + $0x28] sm:$0xff] %v1632_v16 }
  0x38 PF: > { %v374_v17 = vld [vmem:[%s1739_s24 + $0x78] sm:$0xff]  ;;  %v373_v18 = vld [vmem:[%s1739_s24 + $0x70] sm:$0xff]  ;;  %v372_v19 = vld [vmem:[%s1739_s24 + $0x68] sm:$0xff]  ;;  %p1234_p13 = scmp.ne.s32.totalorder %s1614_s14, 1 }
  0x39   : > { %1271 = vmatprep.subr.mxu0 %v374_v17  ;;  %1327 = vmatprep.subr.mxu1 %v374_v17  ;;  %v371_v20 = vld [vmem:[%s1739_s24 + $0x60] sm:$0xff]  ;;  %v370_v21 = vld [vmem:[%s1739_s24 + $0x58] sm:$0xff]  ;;  %v369_v22 = vld [vmem:[%s1739_s24 + $0x50] sm:$0xff] }
  0x3a   : > { %1272 = vmatpush3.msra.mxu0 %v374_v17  ;;  %1343 = vmatpush3.msra.mxu1 %v374_v17  ;;  %v368_v23 = vld [vmem:[%s1739_s24 + $0x48] sm:$0xff]  ;;  %v367_v24 = vld [vmem:[%s1739_s24 + $0x40] sm:$0xff]  ;;  %v366_v25 = vld [vmem:[%s1739_s24 + $0x38] sm:$0xff] }
  0x3b   : > { %1273 = vmatprep.subr.mxu0 %v373_v18  ;;  %1328 = vmatprep.subr.mxu1 %v373_v18  ;;  %v365_v26 = vld [vmem:[%s1739_s24 + $0x30] sm:$0xff]  ;;  %v364_v27 = vld [vmem:[%s1739_s24 + $0x28] sm:$0xff]  ;;  %v363_v28 = vld [vmem:[%s1739_s24 + $0x20] sm:$0xff] }
  0x3c   : > { %1274 = vmatpush3.msra.mxu0 %v373_v18  ;;  %1344 = vmatpush3.msra.mxu1 %v373_v18  ;;  %v362_v29 = vld [vmem:[%s1739_s24 + $0x18] sm:$0xff]  ;;  %v361_v30 = vld [vmem:[%s1739_s24 + $0x10] sm:$0xff]  ;;  %v360_v31 = vld [vmem:[%s1739_s24 + $0x8] sm:$0xff] }
  0x3d   : > { %1275 = vmatprep.subr.mxu0 %v372_v19  ;;  %1329 = vmatprep.subr.mxu1 %v372_v19  ;;  %v359_v32 = vld [vmem:[%s1739_s24] sm:$0xff]  ;;  %v344_v35 = vld [vmem:[%s1746_s12 + $0x8] sm:$0xff]  ;;  %v345_v37 = vld [vmem:[%s1746_s12 + $0x10] sm:$0xff] }
  0x3e   : > { %1276 = vmatpush3.msra.mxu0 %v372_v19  ;;  %1345 = vmatpush3.msra.mxu1 %v372_v19  ;;  %v343_v33 = vld [vmem:[%s1746_s12] sm:$0xff]  ;;  %v352_v36 = vld [vmem:[%s1746_s12 + $0x48] sm:$0xff]  ;;  %v353_v38 = vld [vmem:[%s1746_s12 + $0x50] sm:$0xff] }
  0x3f   : > { %1277 = vmatprep.subr.mxu0 %v371_v20  ;;  %1330 = vmatprep.subr.mxu1 %v371_v20  ;;  %v351_v34 = vld [vmem:[%s1746_s12 + $0x40] sm:$0xff]  ;;  %v346_v39 = vld [vmem:[%s1746_s12 + $0x18] sm:$0xff]  ;;  %v348_v43 = vld [vmem:[%s1746_s12 + $0x28] sm:$0xff] }
  0x40   : > { %1278 = vmatpush3.msra.mxu0 %v371_v20  ;;  %1346 = vmatpush3.msra.mxu1 %v371_v20  ;;  %v354_v40 = vld [vmem:[%s1746_s12 + $0x58] sm:$0xff]  ;;  %v347_v41 = vld [vmem:[%s1746_s12 + $0x20] sm:$0xff]  ;;  %v356_v44 = vld [vmem:[%s1746_s12 + $0x68] sm:$0xff] }
  0x41   : > { %1279 = vmatprep.subr.mxu0 %v370_v21  ;;  %1331 = vmatprep.subr.mxu1 %v370_v21  ;;  %v355_v42 = vld [vmem:[%s1746_s12 + $0x60] sm:$0xff]  ;;  %v349_v45 = vld [vmem:[%s1746_s12 + $0x30] sm:$0xff]  ;;  %v350_v47 = vld [vmem:[%s1746_s12 + $0x38] sm:$0xff] }
  0x42   : > { %1280 = vmatpush3.msra.mxu0 %v370_v21  ;;  %1347 = vmatpush3.msra.mxu1 %v370_v21  ;;  %v357_v46 = vld [vmem:[%s1746_s12 + $0x70] sm:$0xff]  ;;  %v358_v48 = vld [vmem:[%s1746_s12 + $0x78] sm:$0xff]  ;;  %v328_v49 = vld [vmem:[#allocation2] sm:$0xff] }
  0x43   : > { %1281 = vmatprep.subr.mxu0 %v369_v22  ;;  %1332 = vmatprep.subr.mxu1 %v369_v22  ;;  %v336_v50 = vld [vmem:[#allocation2 + $0x20] sm:$0xff]  ;;  %v327_v53 = vld [vmem:[#allocation2 + $0x30] sm:$0xff]  ;;  %v330_v59 = vld [vmem:[#allocation2 + $0x18] sm:$0xff] }
  0x44   : > { %1282 = vmatpush3.msra.mxu0 %v369_v22  ;;  %1348 = vmatpush3.msra.mxu1 %v369_v22  ;;  %v335_v54 = vld [vmem:[#allocation2 + $0x40] sm:$0xff]  ;;  %v338_v60 = vld [vmem:[#allocation2 + $0x38] sm:$0xff]  ;;  %v337_v2 = vld [vmem:[#allocation2 + $0x10] sm:$0xff] }
  0x45   : > { %1283 = vmatprep.subr.mxu0 %v368_v23  ;;  %1333 = vmatprep.subr.mxu1 %v368_v23  ;;  %v329_v1 = vld [vmem:[#allocation2 + $0x58] sm:$0xff]  ;;  %v332_v7 = vld [vmem:[#allocation2 + $0x68] sm:$0xff]  ;;  %v340_v8 = vld [vmem:[#allocation2 + $0x70] sm:$0xff] }
  0x46   : > { %1284 = vmatpush3.msra.mxu0 %v368_v23  ;;  %1349 = vmatpush3.msra.mxu1 %v368_v23  ;;  %v331_v13 = vld [vmem:[#allocation2 + $0x50] sm:$0xff]  ;;  %v339_v14 = vld [vmem:[#allocation2 + $0x60] sm:$0xff]  ;;  %v334_v19 = vld [vmem:[#allocation2 + $0x48] sm:$0xff] }
  0x47   : > { %1285 = vmatprep.subr.mxu0 %v367_v24  ;;  %1334 = vmatprep.subr.mxu1 %v367_v24  ;;  %v342_v20 = vld [vmem:[#allocation2 + $0x28] sm:$0xff] }
  0x48   : > { %1286 = vmatpush3.msra.mxu0 %v367_v24  ;;  %1350 = vmatpush3.msra.mxu1 %v367_v24 }
  0x49   : > { %1287 = vmatprep.subr.mxu0 %v366_v25  ;;  %1335 = vmatprep.subr.mxu1 %v366_v25 }
  0x4a   : > { %1288 = vmatpush3.msra.mxu0 %v366_v25  ;;  %1351 = vmatpush3.msra.mxu1 %v366_v25  ;;  %v333_v25 = vld [vmem:[#allocation2 + $0x8] sm:$0xff] }
  0x4b   : > { %1289 = vmatprep.subr.mxu0 %v365_v26  ;;  %1336 = vmatprep.subr.mxu1 %v365_v26 }
  0x4c   : > { %1290 = vmatpush3.msra.mxu0 %v365_v26  ;;  %1352 = vmatpush3.msra.mxu1 %v365_v26  ;;  %v341_v26 = vld [vmem:[#allocation2 + $0x78] sm:$0xff] }
  0x4d   : > { %1291 = vmatprep.subr.mxu0 %v364_v27  ;;  %1337 = vmatprep.subr.mxu1 %v364_v27 }
  0x4e   : > { %1292 = vmatpush3.msra.mxu0 %v364_v27  ;;  %1353 = vmatpush3.msra.mxu1 %v364_v27 }
  0x4f   : > { %1293 = vmatprep.subr.mxu0 %v363_v28  ;;  %1338 = vmatprep.subr.mxu1 %v363_v28 }
  0x50   : > { %1294 = vmatpush3.msra.mxu0 %v363_v28  ;;  %1354 = vmatpush3.msra.mxu1 %v363_v28 }
  0x51   : > { %1295 = vmatprep.subr.mxu0 %v362_v29  ;;  %1339 = vmatprep.subr.mxu1 %v362_v29 }
  0x52   : > { %1296 = vmatpush3.msra.mxu0 %v362_v29  ;;  %1355 = vmatpush3.msra.mxu1 %v362_v29 }
  0x53   : > { %1297 = vmatprep.subr.mxu0 %v361_v30  ;;  %1340 = vmatprep.subr.mxu1 %v361_v30 }
  0x54   : > { %1298 = vmatpush3.msra.mxu0 %v361_v30  ;;  %1356 = vmatpush3.msra.mxu1 %v361_v30 }
  0x55   : > { %1299 = vmatprep.subr.mxu0 %v360_v31  ;;  %1341 = vmatprep.subr.mxu1 %v360_v31 }
  0x56   : > { %1300 = vmatpush3.msra.mxu0 %v360_v31  ;;  %1357 = vmatpush3.msra.mxu1 %v360_v31 }
  0x57   : > { %1301 = vmatprep.subr.mxu0 %v359_v32  ;;  %1342 = vmatprep.subr.mxu1 %v359_v32 }
  0x58   : > { %1302 = vmatpush3.msra.mxu0 %v359_v32  ;;  %1358 = vmatpush3.msra.mxu1 %v359_v32 }
  0x59   : > { %1303 = vmatprep.mubr.f32.mxu0 %v343_v33  ;;  %1315 = vmatprep.mubr.f32.mxu1 %v351_v34 }
  0x5a   : > { %1304 = vmatmul.mubr.f32.vlgmr.msra.gmra.mxu0 %v344_v35  ;;  %1316 = vmatmul.mubr.f32.vlgmr.msra.gmra.mxu1 %v352_v36 }
  0x5b   : > { %1306 = vmatprep.mubr.f32.mxu0 %v345_v37  ;;  %1318 = vmatprep.mubr.f32.mxu1 %v353_v38 }
  0x5e   : > { %1307 = vmatmul.mubr.f32.gmra.mxu0 %v346_v39  ;;  %1319 = vmatmul.mubr.f32.gmra.mxu1 %v354_v40 }
  0x5f   : > { %1309 = vmatprep.mubr.f32.mxu0 %v347_v41  ;;  %1321 = vmatprep.mubr.f32.mxu1 %v355_v42 }
  0x62   : > { %1310 = vmatmul.mubr.f32.gmra.mxu0 %v348_v43  ;;  %1322 = vmatmul.mubr.f32.gmra.mxu1 %v356_v44 }
  0x63   : > { %1312 = vmatprep.mubr.f32.mxu0 %v349_v45  ;;  %1324 = vmatprep.mubr.f32.mxu1 %v357_v46 }
  0x66   : > { %1313 = vmatmul.mubr.f32.gmra.mxu0 %v350_v47  ;;  %1325 = vmatmul.mubr.f32.gmra.mxu1 %v358_v48 }
 0x11a   : > { %v1305_v51 = vpop.f32.mrf.mxu0  ;;  %v1317_v52 = vpop.f32.mrf.mxu1 }
 0x11b   : > { %v521_v55 = vadd.f32 %v1305_v51, %v328_v49  ;;  %v529_v56 = vadd.f32 %v1317_v52, %v336_v50 }
 0x11c   : > { %v441_v57 = vpop.f32.mrf.mxu0  ;;  %v481_v58 = vpop.f32.mrf.mxu1 }
 0x11d   : > { %537 = vst [vmem:[#allocation2] sm:$0xff] %v521_v55  ;;  %545 = vst [vmem:[#allocation2 + $0x20] sm:$0xff] %v529_v56  ;;  %v520_v61 = vadd.f32 %v441_v57, %v327_v53  ;;  %v528_v62 = vadd.f32 %v481_v58, %v335_v54 }
 0x11e   : > { %v1308_v63 = vpop.f32.mrf.mxu0  ;;  %v1320_v0 = vpop.f32.mrf.mxu1 }
 0x11f   : > { %536 = vst [vmem:[#allocation2 + $0x30] sm:$0xff] %v520_v61  ;;  %544 = vst [vmem:[#allocation2 + $0x40] sm:$0xff] %v528_v62  ;;  %v523_v3 = vadd.f32 %v1308_v63, %v330_v59  ;;  %v531_v4 = vadd.f32 %v1320_v0, %v338_v60 }
 0x120   : > { %v451_v5 = vpop.f32.mrf.mxu0  ;;  %v491_v6 = vpop.f32.mrf.mxu1 }
 0x121   : > { %539 = vst [vmem:[#allocation2 + $0x18] sm:$0xff] %v523_v3  ;;  %547 = vst [vmem:[#allocation2 + $0x38] sm:$0xff] %v531_v4  ;;  %v522_v9 = vadd.f32 %v451_v5, %v329_v1  ;;  %v530_v10 = vadd.f32 %v491_v6, %v337_v2 }
 0x122   : > { %v1311_v11 = vpop.f32.mrf.mxu0  ;;  %v1323_v12 = vpop.f32.mrf.mxu1 }
 0x123   : > { %538 = vst [vmem:[#allocation2 + $0x58] sm:$0xff] %v522_v9  ;;  %546 = vst [vmem:[#allocation2 + $0x10] sm:$0xff] %v530_v10  ;;  %v525_v15 = vadd.f32 %v1311_v11, %v332_v7  ;;  %v533_v16 = vadd.f32 %v1323_v12, %v340_v8 }
 0x124   : > { %v461_v17 = vpop.f32.mrf.mxu0  ;;  %v501_v18 = vpop.f32.mrf.mxu1 }
 0x125   : > { %541 = vst [vmem:[#allocation2 + $0x68] sm:$0xff] %v525_v15  ;;  %549 = vst [vmem:[#allocation2 + $0x70] sm:$0xff] %v533_v16  ;;  %v524_v21 = vadd.f32 %v461_v17, %v331_v13  ;;  %v532_v22 = vadd.f32 %v501_v18, %v339_v14 }
 0x126   : > { %v1314_v23 = vpop.f32.mrf.mxu0  ;;  %v1326_v24 = vpop.f32.mrf.mxu1 }
 0x127   : > { %540 = vst [vmem:[#allocation2 + $0x50] sm:$0xff] %v524_v21  ;;  %548 = vst [vmem:[#allocation2 + $0x60] sm:$0xff] %v532_v22  ;;  %v527_v27 = vadd.f32 %v1314_v23, %v334_v19  ;;  %v535_v28 = vadd.f32 %v1326_v24, %v342_v20  ;;  %555 = sbr.rel (%p1234_p13) target bundleno = 736 (0x2e0), region = 78 }
 0x128   : > { %v471_v29 = vpop.f32.mrf.mxu0  ;;  %v511_v30 = vpop.f32.mrf.mxu1 }
 0x129   : > { %543 = vst [vmem:[#allocation2 + $0x48] sm:$0xff] %v527_v27  ;;  %551 = vst [vmem:[#allocation2 + $0x28] sm:$0xff] %v535_v28  ;;  %v526_v31 = vadd.f32 %v471_v29, %v333_v25  ;;  %v534_v32 = vadd.f32 %v511_v30, %v341_v26 }
 0x12b   : > { %542 = vst [vmem:[#allocation2 + $0x8] sm:$0xff] %v526_v31  ;;  %550 = vst [vmem:[#allocation2 + $0x78] sm:$0xff] %v534_v32 }
 0x12c   : > { %v558_v33 = vld [vmem:[#allocation2 + $0x58] sm:$0xff]  ;;  %v1235_v34 = vld [vmem:[%s2626_s2] ss:$0 sm:$0xff]  ;;  %v595_v35 = vlaneseq  ;;  %v556_v36 = vld [vmem:[#allocation2 + $0x30] sm:$0xff]  ;;  %v2691_v44 = vmov 0 }
 0x12d   : > { %v559_v37 = vld [vmem:[#allocation2 + $0x18] sm:$0xff]  ;;  %v557_v38 = vld [vmem:[#allocation2] sm:$0xff]  ;;  %v1785_v39 = vadd.f32 %v1235_v34, %v558_v33  ;;  %v1789_v41 = vadd.f32 %v1235_v34, %v556_v36  ;;  %v561_v45 = vld [vmem:[#allocation2 + $0x68] sm:$0xff] }
 0x12e   : > { %v1787_v40 = vand.u32 127, %v595_v35  ;;  %v1793_v42 = vadd.f32 %v1235_v34, %v559_v37  ;;  %v1795_v43 = vadd.f32 %v1235_v34, %v557_v38  ;;  %v560_v46 = vld [vmem:[#allocation2 + $0x50] sm:$0xff]  ;;  %v1823_v51 = vadd.f32 %v1235_v34, %v561_v45  ;;  %v565_v59 = vld [vmem:[#allocation2 + $0x20] sm:$0xff]  ;;  %v567_v1 = vld [vmem:[#allocation2 + $0x38] sm:$0xff] }
 0x12f   : > { %2688 = vst [vmem:[#allocation4_spill] sm:$0xff] %v1789_v41  ;;  %v1825_v52 = vadd.f32 %v1235_v34, %v560_v46  ;;  %v564_v60 = vld [vmem:[#allocation2 + $0x40] sm:$0xff]  ;;  %v1855_v63 = vadd.f32 %v1235_v34, %v565_v59  ;;  %v566_v2 = vld [vmem:[#allocation2 + $0x10] sm:$0xff]  ;;  %v1871_v5 = vadd.f32 %v1235_v34, %v567_v1 }
 0x130   : > { %vm871_vm0 = vcmp.ge.s32.totalorder %v1787_v40, 4  ;;  %vm872_vm1 = vcmp.lt.s32.totalorder %v1787_v40, 6  ;;  %2689 = vst [vmem:[#allocation5_spill] sm:$0xff] %v1793_v42  ;;  %2690 = vst [vmem:[#allocation6_spill] sm:$0xff] %v1795_v43  ;;  %v563_v53 = vld [vmem:[#allocation2 + $0x48] sm:$0xff]  ;;  %v1857_v0 = vadd.f32 %v1235_v34, %v564_v60  ;;  %v1873_v6 = vadd.f32 %v1235_v34, %v566_v2  ;;  %v569_v7 = vld [vmem:[#allocation2 + $0x70] sm:$0xff] }
 0x131   : > { %vm1797_vm2 = vmand %vm871_vm0, %vm872_vm1  ;;  %2694 = vst [vmem:[#allocation8_spill] sm:$0xff] %v1823_v51  ;;  %v1839_v57 = vadd.f32 %v1235_v34, %v563_v53  ;;  %v568_v8 = vld [vmem:[#allocation2 + $0x60] sm:$0xff]  ;;  %v1887_v11 = vadd.f32 %v1235_v34, %v569_v7  ;;  %v571_v13 = vld [vmem:[#allocation2 + $0x28] sm:$0xff]  ;;  %vm597_vm3 = vcmp.lt.s32.totalorder %v1787_v40, 4  ;;  %vm790_vm4 = vcmp.eq.s32.totalorder %v1787_v40, 3 }
 0x132   : > { %v2692_v44 = vsel %vm1797_vm2, 4294967295, %v2691_v44  ;;  %v1804_v47 = vsel %vm1797_vm2, %v1785_v39, -inf  ;;  %v1809_v48 = vsel %vm1797_vm2, %v1789_v41, -inf  ;;  %v1816_v49 = vsel %vm1797_vm2, %v1793_v42, -inf  ;;  %2695 = vst [vmem:[#allocation9_spill] sm:$0xff] %v1825_v52  ;;  %v562_v54 = vld [vmem:[#allocation2 + $0x8] sm:$0xff] }
 0x133   : > { %2693 = vst [vmem:[#allocation7_spill] sm:$0xff] %v2692_v44  ;;  %894 = vmax.xlane.f32.xlu1 %v1804_v47  ;;  %890 = vmax.xlane.f32.xlu0 %v1809_v48  ;;  %v1821_v50 = vsel %vm1797_vm2, %v1795_v43, -inf  ;;  %v1832_v55 = vsel %vm1797_vm2, %v1823_v51, -inf  ;;  %v1837_v56 = vsel %vm1797_vm2, %v1825_v52, -inf  ;;  %2696 = vst [vmem:[#allocation10_spill] sm:$0xff] %v1839_v57  ;;  %v1841_v58 = vadd.f32 %v1235_v34, %v562_v54  ;;  %v570_v14 = vld [vmem:[#allocation2 + $0x78] sm:$0xff] }
 0x134   : > { %v1848_v61 = vsel %vm1797_vm2, %v1839_v57, -inf  ;;  %2698 = vst [vmem:[#allocation12_spill] sm:$0xff] %v1855_v63  ;;  %2699 = vst [vmem:[#allocation13_spill] sm:$0xff] %v1857_v0  ;;  %v1864_v3 = vsel %vm1797_vm2, %v1855_v63, -inf  ;;  %v1869_v4 = vsel %vm1797_vm2, %v1857_v0, -inf  ;;  %v1880_v9 = vsel %vm1797_vm2, %v1871_v5, -inf }
 0x135   : > { %2697 = vst [vmem:[#allocation11_spill] sm:$0xff] %v1841_v58  ;;  %v1853_v62 = vsel %vm1797_vm2, %v1841_v58, -inf  ;;  %2700 = vst [vmem:[#allocation14_spill] sm:$0xff] %v1871_v5  ;;  %v1885_v10 = vsel %vm1797_vm2, %v1873_v6, -inf  ;;  %v1889_v12 = vadd.f32 %v1235_v34, %v568_v8  ;;  %v1896_v15 = vsel %vm1797_vm2, %v1887_v11, -inf }
 0x136   : > { %2701 = vst [vmem:[#allocation15_spill] sm:$0xff] %v1873_v6  ;;  %2702 = vst [vmem:[#allocation16_spill] sm:$0xff] %v1887_v11  ;;  %v1903_v17 = vadd.f32 %v1235_v34, %v571_v13  ;;  %v1905_v18 = vadd.f32 %v1235_v34, %v570_v14  ;;  %v599_v21 = vsel %vm597_vm3, %v1795_v43, -inf  ;;  %v598_v22 = vsel %vm597_vm3, %v1789_v41, -inf }
 0x137   : > { %896 = vmax.xlane.f32.xlu1 %v1816_v49  ;;  %892 = vmax.xlane.f32.xlu0 %v1821_v50  ;;  %2703 = vst [vmem:[#allocation17_spill] sm:$0xff] %v1889_v12  ;;  %v1901_v16 = vsel %vm1797_vm2, %v1889_v12, -inf  ;;  %v601_v23 = vsel %vm597_vm3, %v1793_v42, -inf  ;;  %v600_v24 = vsel %vm597_vm3, %v1785_v39, -inf  ;;  %v603_v25 = vsel %vm597_vm3, %v1823_v51, -inf }
 0x138   : > { %2704 = vst [vmem:[#allocation18_spill] sm:$0xff] %v1903_v17  ;;  %2705 = vst [vmem:[#allocation19_spill] sm:$0xff] %v1905_v18  ;;  %v1912_v19 = vsel %vm1797_vm2, %v1903_v17, -inf  ;;  %v1917_v20 = vsel %vm1797_vm2, %v1905_v18, -inf  ;;  %v602_v26 = vsel %vm597_vm3, %v1825_v52, -inf  ;;  %v1943_v27 = vsel %vm597_vm3, %v1839_v57, -inf }
 0x139   : > { %v1948_v28 = vsel %vm597_vm3, %v1841_v58, -inf  ;;  %v1955_v29 = vsel %vm597_vm3, %v1855_v63, -inf  ;;  %v1960_v30 = vsel %vm597_vm3, %v1857_v0, -inf  ;;  %v1967_v31 = vsel %vm597_vm3, %v1871_v5, -inf }
 0x13a   : > { %v1972_v32 = vsel %vm597_vm3, %v1873_v6, -inf  ;;  %v1979_v33 = vsel %vm597_vm3, %v1887_v11, -inf  ;;  %v1984_v34 = vsel %vm597_vm3, %v1889_v12, -inf  ;;  %v1991_v35 = vsel %vm597_vm3, %v1903_v17, -inf }
 0x13b   : > { %900 = vmax.xlane.f32.xlu1 %v1832_v55  ;;  %898 = vmax.xlane.f32.xlu0 %v1837_v56  ;;  %v1996_v36 = vsel %vm597_vm3, %v1905_v18, -inf  ;;  %vm1066_vm5 = vcmp.eq.s32.totalorder %v1787_v40, 6 }
 0x13f   : > { %904 = vmax.xlane.f32.xlu1 %v1848_v61  ;;  %902 = vmax.xlane.f32.xlu0 %v1853_v62 }
 0x143   : > { %908 = vmax.xlane.f32.xlu1 %v1864_v3  ;;  %906 = vmax.xlane.f32.xlu0 %v1869_v4 }
 0x147   : > { %912 = vmax.xlane.f32.xlu1 %v1880_v9  ;;  %910 = vmax.xlane.f32.xlu0 %v1885_v10 }
 0x14b   : > { %916 = vmax.xlane.f32.xlu1 %v1896_v15  ;;  %914 = vmax.xlane.f32.xlu0 %v1901_v16 }
 0x14f   : > { %920 = vmax.xlane.f32.xlu1 %v1912_v19  ;;  %918 = vmax.xlane.f32.xlu0 %v1917_v20 }
 0x153   : > { %616 = vmax.xlane.f32.xlu1 %v599_v21  ;;  %614 = vmax.xlane.f32.xlu0 %v598_v22 }
 0x157   : > { %620 = vmax.xlane.f32.xlu1 %v601_v23  ;;  %618 = vmax.xlane.f32.xlu0 %v600_v24 }
 0x15b   : > { %624 = vmax.xlane.f32.xlu1 %v603_v25  ;;  %622 = vmax.xlane.f32.xlu0 %v602_v26 }
 0x15f   : > { %628 = vmax.xlane.f32.xlu1 %v1943_v27  ;;  %626 = vmax.xlane.f32.xlu0 %v1948_v28 }
 0x163   : > { %632 = vmax.xlane.f32.xlu1 %v1955_v29  ;;  %630 = vmax.xlane.f32.xlu0 %v1960_v30 }
 0x167   : > { %636 = vmax.xlane.f32.xlu1 %v1967_v31  ;;  %634 = vmax.xlane.f32.xlu0 %v1972_v32 }
 0x16b   : > { %640 = vmax.xlane.f32.xlu1 %v1979_v33  ;;  %638 = vmax.xlane.f32.xlu0 %v1984_v34 }
 0x16f   : > { %644 = vmax.xlane.f32.xlu1 %v1991_v35  ;;  %642 = vmax.xlane.f32.xlu0 %v1996_v36 }
 0x1bc   : > { %v2000_v37 = vpop.xlane.xlu1 %894  ;;  %v2002_v38 = vpop.xlane.xlu0 %890 }
 0x1bd   : > { %2706 = vst [vmem:[#allocation20_spill] sm:$0xff] %v2000_v37 }
 0x1c0   : > { %v2004_v45 = vpop.xlane.xlu1 %896  ;;  %v2006_v46 = vpop.xlane.xlu0 %892 }
 0x1c1   : > { %2707 = vst [vmem:[#allocation21_spill] sm:$0xff] %v2004_v45 }
 0x1c4   : > { %v2008_v53 = vpop.xlane.xlu1 %900  ;;  %v2010_v54 = vpop.xlane.xlu0 %898 }
 0x1c5   : > { %2708 = vst [vmem:[#allocation22_spill] sm:$0xff] %v2008_v53  ;;  %2709 = vst [vmem:[#allocation23_spill] sm:$0xff] %v2010_v54 }
 0x1c8   : > { %v2012_v59 = vpop.xlane.xlu1 %904  ;;  %v2014_v60 = vpop.xlane.xlu0 %902 }
 0x1c9   : > { %2710 = vst [vmem:[#allocation24_spill] sm:$0xff] %v2012_v59  ;;  %2711 = vst [vmem:[#allocation25_spill] sm:$0xff] %v2014_v60 }
 0x1cc   : > { %v2016_v1 = vpop.xlane.xlu1 %908  ;;  %v2018_v2 = vpop.xlane.xlu0 %906 }
 0x1cd   : > { %2712 = vst [vmem:[#allocation26_spill] sm:$0xff] %v2016_v1  ;;  %2713 = vst [vmem:[#allocation27_spill] sm:$0xff] %v2018_v2 }
 0x1d0   : > { %v2020_v7 = vpop.xlane.xlu1 %912  ;;  %v2022_v8 = vpop.xlane.xlu0 %910 }
 0x1d1   : > { %2714 = vst [vmem:[#allocation28_spill] sm:$0xff] %v2020_v7  ;;  %2715 = vst [vmem:[#allocation29_spill] sm:$0xff] %v2022_v8 }
 0x1d4   : > { %v2024_v13 = vpop.xlane.xlu1 %916  ;;  %v2026_v14 = vpop.xlane.xlu0 %914 }
 0x1d5   : > { %2716 = vst [vmem:[#allocation30_spill] sm:$0xff] %v2024_v13  ;;  %2717 = vst [vmem:[#allocation31_spill] sm:$0xff] %v2026_v14 }
 0x1d8   : > { %v2028_v44 = vpop.xlane.xlu1 %920  ;;  %v2030_v18 = vpop.xlane.xlu0 %918 }
 0x1d9   : > { %2718 = vst [vmem:[#allocation32_spill] sm:$0xff] %v2028_v44  ;;  %2719 = vst [vmem:[#allocation33_spill] sm:$0xff] %v2030_v18 }
 0x1dc   : > { %v2032_v17 = vpop.xlane.xlu1 %616  ;;  %v2034_v12 = vpop.xlane.xlu0 %614 }
 0x1dd   : > { %v647_v11 = vsub.f32 %v599_v21, %v2032_v17  ;;  %v646_v6 = vsub.f32 %v598_v22, %v2034_v12 }
 0x1df   : > { %v664_v5 = vmul.f32 1.442695, %v647_v11  ;;  %v662_v0 = vmul.f32 1.442695, %v646_v6 }
 0x1e0   : > { %v2038_v63 = vpop.xlane.xlu1 %620  ;;  %v2040_v58 = vpop.xlane.xlu0 %618 }
 0x1e1   : > { %1416 = vpow2.f32 %v664_v5  ;;  %v649_v57 = vsub.f32 %v601_v23, %v2038_v63  ;;  %v648_v52 = vsub.f32 %v600_v24, %v2040_v58 }
 0x1e2   : > { %1418 = vpow2.f32 %v662_v0 }
 0x1e3   : > { %v668_v51 = vmul.f32 1.442695, %v649_v57  ;;  %v666_v43 = vmul.f32 1.442695, %v648_v52 }
 0x1e4   : > { %v2044_v42 = vpop.xlane.xlu1 %624  ;;  %v2046_v41 = vpop.xlane.xlu0 %622 }
 0x1e5   : > { %1420 = vpow2.f32 %v668_v51  ;;  %v651_v11 = vsub.f32 %v603_v25, %v2044_v42  ;;  %v650_v6 = vsub.f32 %v602_v26, %v2046_v41 }
 0x1e6   : > { %1422 = vpow2.f32 %v666_v43 }
 0x1e7   : > { %v672_v21 = vmul.f32 1.442695, %v651_v11  ;;  %v670_v22 = vmul.f32 1.442695, %v650_v6 }
 0x1e8   : > { %v2050_v5 = vpop.xlane.xlu1 %628  ;;  %v2052_v23 = vpop.xlane.xlu0 %626 }
 0x1e9   : > { %1424 = vpow2.f32 %v672_v21  ;;  %v653_v52 = vsub.f32 %v1943_v27, %v2050_v5  ;;  %v652_v57 = vsub.f32 %v1948_v28, %v2052_v23 }
 0x1ea   : > { %1426 = vpow2.f32 %v670_v22 }
 0x1eb   : > { %v676_v51 = vmul.f32 1.442695, %v653_v52  ;;  %v674_v0 = vmul.f32 1.442695, %v652_v57 }
 0x1ec   : > { %v2058_v24 = vpop.xlane.xlu1 %632  ;;  %v2060_v25 = vpop.xlane.xlu0 %630 }
 0x1ed   : > { %2720 = vst [vmem:[#allocation34_spill] sm:$0xff] %v2060_v25  ;;  %1428 = vpow2.f32 %v676_v51  ;;  %v655_v43 = vsub.f32 %v1955_v29, %v2058_v24  ;;  %v654_v26 = vsub.f32 %v1960_v30, %v2060_v25 }
 0x1ee   : > { %v2066_v11 = vpop.eup %1416  ;;  %1430 = vpow2.f32 %v674_v0 }
 0x1ef   : > { %v2068_v27 = vpop.eup %1418  ;;  %v680_v28 = vmul.f32 1.442695, %v655_v43  ;;  %v678_v6 = vmul.f32 1.442695, %v654_v26  ;;  %696 = vadd.xlane.f32.xlu1 %v2066_v11 }
 0x1f0   : > { %694 = vadd.xlane.f32.xlu0 %v2068_v27  ;;  %v2072_v21 = vpop.xlane.xlu1 %636  ;;  %v2074_v22 = vpop.xlane.xlu0 %634 }
 0x1f1   : > { %2721 = vst [vmem:[#allocation35_spill] sm:$0xff] %v2072_v21  ;;  %2722 = vst [vmem:[#allocation36_spill] sm:$0xff] %v2074_v22  ;;  %1432 = vpow2.f32 %v680_v28  ;;  %v657_v29 = vsub.f32 %v1967_v31, %v2072_v21  ;;  %v656_v30 = vsub.f32 %v1972_v32, %v2074_v22 }
 0x1f2   : > { %v2080_v52 = vpop.eup %1420  ;;  %1434 = vpow2.f32 %v678_v6 }
 0x1f3   : > { %v2082_v57 = vpop.eup %1422  ;;  %v684_v51 = vmul.f32 1.442695, %v657_v29  ;;  %v682_v0 = vmul.f32 1.442695, %v656_v30  ;;  %700 = vadd.xlane.f32.xlu1 %v2080_v52 }
 0x1f4   : > { %698 = vadd.xlane.f32.xlu0 %v2082_v57  ;;  %v2086_v43 = vpop.xlane.xlu1 %640  ;;  %v2088_v26 = vpop.xlane.xlu0 %638 }
 0x1f5   : > { %2723 = vst [vmem:[#allocation37_spill] sm:$0xff] %v2086_v43  ;;  %2724 = vst [vmem:[#allocation38_spill] sm:$0xff] %v2088_v26  ;;  %1436 = vpow2.f32 %v684_v51  ;;  %v659_v31 = vsub.f32 %v1979_v33, %v2086_v43  ;;  %v658_v32 = vsub.f32 %v1984_v34, %v2088_v26  ;;  %v922_v33 = vsub.f32 %v1809_v48, %v2002_v38 }
 0x1f6   : > { %v2094_v28 = vpop.eup %1424  ;;  %1438 = vpow2.f32 %v682_v0  ;;  %v924_v48 = vsub.f32 %v1804_v47, %v2000_v37  ;;  %v926_v47 = vsub.f32 %v1837_v56, %v2010_v54 }
 0x1f7   : > { %v2096_v6 = vpop.eup %1426  ;;  %v688_v29 = vmul.f32 1.442695, %v659_v31  ;;  %v686_v30 = vmul.f32 1.442695, %v658_v32  ;;  %704 = vadd.xlane.f32.xlu1 %v2094_v28  ;;  %v923_v32 = vsub.f32 %v1821_v50, %v2006_v46 }
 0x1f8   : > { %702 = vadd.xlane.f32.xlu0 %v2096_v6  ;;  %v2100_v22 = vpop.xlane.xlu1 %644  ;;  %v2102_v51 = vpop.xlane.xlu0 %642 }
 0x1f9   : > { %2725 = vst [vmem:[#allocation39_spill] sm:$0xff] %v2100_v22  ;;  %2726 = vst [vmem:[#allocation40_spill] sm:$0xff] %v2102_v51  ;;  %1440 = vpow2.f32 %v688_v29  ;;  %v661_v34 = vsub.f32 %v1991_v35, %v2100_v22  ;;  %v660_v0 = vsub.f32 %v1996_v36, %v2102_v51  ;;  %v938_v35 = vmul.f32 1.442695, %v922_v33  ;;  %v2735_v22 = vld [vmem:[#allocation9_spill] sm:$0xff] }
 0x1fa   : > { %v2110_v31 = vpop.eup %1428  ;;  %1442 = vpow2.f32 %v686_v30  ;;  %v925_v29 = vsub.f32 %v1816_v49, %v2004_v45  ;;  %v940_v50 = vmul.f32 1.442695, %v923_v32  ;;  %v927_v49 = vsub.f32 %v1832_v55, %v2008_v53  ;;  %v2743_v45 = vld [vmem:[#allocation16_spill] sm:$0xff]  ;;  %v2744_v53 = vld [vmem:[#allocation17_spill] sm:$0xff] }
 0x1fb   : > { %v2114_v26 = vpop.eup %1430  ;;  %v692_v43 = vmul.f32 1.442695, %v661_v34  ;;  %v690_v21 = vmul.f32 1.442695, %v660_v0  ;;  %708 = vadd.xlane.f32.xlu1 %v2110_v31  ;;  %v942_v34 = vmul.f32 1.442695, %v924_v48  ;;  %v928_v32 = vsub.f32 %v1853_v62, %v2014_v60 }
 0x1fc   : > { %706 = vadd.xlane.f32.xlu0 %v2114_v26  ;;  %v948_v56 = vmul.f32 1.442695, %v927_v49  ;;  %v932_v49 = vsub.f32 %v1885_v10, %v2022_v8  ;;  %v935_v10 = vsub.f32 %v1896_v15, %v2024_v13  ;;  %v2750_v60 = vld [vmem:[#allocation38_spill] sm:$0xff] }
 0x1fd   : > { %1444 = vpow2.f32 %v692_v43  ;;  %v944_v43 = vmul.f32 1.442695, %v925_v29  ;;  %v950_v55 = vmul.f32 1.442695, %v928_v32  ;;  %v933_v32 = vsub.f32 %v1880_v9, %v2020_v7 }
 0x1fe   : > { %v2120_v36 = vpop.eup %1432  ;;  %1446 = vpow2.f32 %v690_v21  ;;  %v946_v21 = vmul.f32 1.442695, %v926_v47  ;;  %v931_v47 = vsub.f32 %v1864_v3, %v2016_v1  ;;  %v958_v3 = vmul.f32 1.442695, %v932_v49 }
 0x1ff   : > { %v2124_v30 = vpop.eup %1434  ;;  %712 = vadd.xlane.f32.xlu1 %v2120_v36  ;;  %1448 = vpow2.f32 %v938_v35  ;;  %v929_v35 = vsub.f32 %v1848_v61, %v2012_v59  ;;  %v936_v9 = vsub.f32 %v1917_v20, %v2030_v18 }
 0x200   : > { %710 = vadd.xlane.f32.xlu0 %v2124_v30  ;;  %1450 = vpow2.f32 %v940_v50  ;;  %v930_v50 = vsub.f32 %v1869_v4, %v2018_v2  ;;  %v956_v4 = vmul.f32 1.442695, %v931_v47 }
 0x201   : > { %1452 = vpow2.f32 %v942_v34  ;;  %v952_v62 = vmul.f32 1.442695, %v929_v35  ;;  %v934_v35 = vsub.f32 %v1901_v16, %v2026_v14  ;;  %v937_v16 = vsub.f32 %v1912_v19, %v2028_v44 }
 0x202   : > { %v2130_v33 = vpop.eup %1436  ;;  %1454 = vpow2.f32 %v944_v43  ;;  %v954_v61 = vmul.f32 1.442695, %v930_v50 }
 0x203   : > { %v2134_v0 = vpop.eup %1438  ;;  %716 = vadd.xlane.f32.xlu1 %v2130_v33  ;;  %1456 = vpow2.f32 %v946_v21 }
 0x204   : > { %714 = vadd.xlane.f32.xlu0 %v2134_v0  ;;  %1458 = vpow2.f32 %v948_v56 }
 0x205   : > { %1460 = vpow2.f32 %v950_v55  ;;  %v960_v55 = vmul.f32 1.442695, %v933_v32 }
 0x206   : > { %v2140_v48 = vpop.eup %1440  ;;  %1462 = vpow2.f32 %v952_v62  ;;  %v962_v62 = vmul.f32 1.442695, %v934_v35 }
 0x207   : > { %v2144_v29 = vpop.eup %1442  ;;  %720 = vadd.xlane.f32.xlu1 %v2140_v48  ;;  %1464 = vpow2.f32 %v954_v61  ;;  %v964_v61 = vmul.f32 1.442695, %v935_v10 }
 0x208   : > { %718 = vadd.xlane.f32.xlu0 %v2144_v29  ;;  %1466 = vpow2.f32 %v956_v4 }
 0x209   : > { %1468 = vpow2.f32 %v958_v3 }
 0x20a   : > { %v2150_v34 = vpop.eup %1444  ;;  %1470 = vpow2.f32 %v960_v55 }
 0x20b   : > { %v2154_v43 = vpop.eup %1446  ;;  %724 = vadd.xlane.f32.xlu1 %v2150_v34  ;;  %1472 = vpow2.f32 %v962_v62  ;;  %v791_v62 = vsel %vm790_vm4, %v2068_v27, 0.0  ;;  %v795_v27 = vsel %vm790_vm4, %v2096_v6, 0.0  ;;  %v799_v6 = vsel %vm790_vm4, %v2124_v30, 0.0 }
 0x20c   : > { %722 = vadd.xlane.f32.xlu0 %v2154_v43  ;;  %v1449_v21 = vpop.eup %1448  ;;  %1474 = vpow2.f32 %v964_v61  ;;  %v803_v30 = vsel %vm790_vm4, %v2144_v29, 0.0 }
 0x20d   : > { %v1451_v56 = vpop.eup %1450 }
 0x20e   : > { %v1453_v51 = vpop.eup %1452 }
 0x20f   : > { %970 = vadd.xlane.f32.xlu1 %v1449_v21  ;;  %v1455_v50 = vpop.eup %1454  ;;  %v966_v21 = vmul.f32 1.442695, %v936_v9  ;;  %v794_v9 = vsel %vm790_vm4, %v2080_v52, 0.0  ;;  %v798_v52 = vsel %vm790_vm4, %v2110_v31, 0.0  ;;  %v802_v31 = vsel %vm790_vm4, %v2130_v33, 0.0 }
 0x210   : > { %972 = vadd.xlane.f32.xlu0 %v1451_v56  ;;  %v1457_v47 = vpop.eup %1456  ;;  %v806_v33 = vsel %vm790_vm4, %v2150_v34, 0.0 }
 0x211   : > { %v1459_v49 = vpop.eup %1458  ;;  %1476 = vpow2.f32 %v966_v21 }
 0x212   : > { %v1461_v15 = vpop.eup %1460 }
 0x213   : > { %974 = vadd.xlane.f32.xlu1 %v1453_v51  ;;  %v968_v51 = vmul.f32 1.442695, %v937_v16  ;;  %v1463_v4 = vpop.eup %1462 }
 0x214   : > { %976 = vadd.xlane.f32.xlu0 %v1455_v50  ;;  %v1465_v32 = vpop.eup %1464  ;;  %v792_v50 = vsel %vm790_vm4, %v2066_v11, 0.0  ;;  %v796_v11 = vsel %vm790_vm4, %v2094_v28, 0.0  ;;  %v800_v28 = vsel %vm790_vm4, %v2120_v36, 0.0  ;;  %v804_v36 = vsel %vm790_vm4, %v2140_v48, 0.0 }
 0x215   : > { %1478 = vpow2.f32 %v968_v51  ;;  %v1467_v20 = vpop.eup %1466 }
 0x216   : > { %v1469_v56 = vpop.eup %1468 }
 0x217   : > { %978 = vadd.xlane.f32.xlu1 %v1457_v47  ;;  %v1471_v3 = vpop.eup %1470  ;;  %v793_v47 = vsel %vm790_vm4, %v2082_v57, 0.0  ;;  %v797_v57 = vsel %vm790_vm4, %v2114_v26, 0.0  ;;  %v801_v26 = vsel %vm790_vm4, %v2134_v0, 0.0  ;;  %v805_v0 = vsel %vm790_vm4, %v2154_v43, 0.0 }
 0x218   : > { %980 = vadd.xlane.f32.xlu0 %v1459_v49  ;;  %v1473_v19 = vpop.eup %1472 }
 0x219   : > { %v1475_v35 = vpop.eup %1474 }
 0x21b   : > { %982 = vadd.xlane.f32.xlu1 %v1461_v15 }
 0x21c   : > { %984 = vadd.xlane.f32.xlu0 %v1463_v4 }
 0x21e   : > { %v1477_v55 = vpop.eup %1476 }
 0x21f   : > { %986 = vadd.xlane.f32.xlu1 %v1465_v32 }
 0x220   : > { %988 = vadd.xlane.f32.xlu0 %v1467_v20 }
 0x222   : > { %v1479_v10 = vpop.eup %1478 }
 0x223   : > { %990 = vadd.xlane.f32.xlu1 %v1469_v56 }
 0x224   : > { %992 = vadd.xlane.f32.xlu0 %v1471_v3 }
 0x227   : > { %994 = vadd.xlane.f32.xlu1 %v1473_v19 }
 0x228   : > { %996 = vadd.xlane.f32.xlu0 %v1475_v35 }
 0x22b   : > { %998 = vadd.xlane.f32.xlu1 %v1477_v55 }
 0x22c   : > { %1000 = vadd.xlane.f32.xlu0 %v1479_v10 }
 0x22f   : > { %809 = vadd.xlane.f32.xlu1 %v792_v50 }
 0x230   : > { %807 = vadd.xlane.f32.xlu0 %v791_v62 }
 0x233   : > { %813 = vadd.xlane.f32.xlu1 %v794_v9 }
 0x234   : > { %811 = vadd.xlane.f32.xlu0 %v793_v47 }
 0x237   : > { %817 = vadd.xlane.f32.xlu1 %v796_v11 }
 0x238   : > { %815 = vadd.xlane.f32.xlu0 %v795_v27 }
 0x23b   : > { %821 = vadd.xlane.f32.xlu1 %v798_v52 }
 0x23c   : > { %819 = vadd.xlane.f32.xlu0 %v797_v57 }
 0x23f   : > { %825 = vadd.xlane.f32.xlu1 %v800_v28 }
 0x240   : > { %823 = vadd.xlane.f32.xlu0 %v799_v6 }
 0x243   : > { %829 = vadd.xlane.f32.xlu1 %v802_v31 }
 0x244   : > { %827 = vadd.xlane.f32.xlu0 %v801_v26 }
 0x247   : > { %833 = vadd.xlane.f32.xlu1 %v804_v36 }
 0x248   : > { %831 = vadd.xlane.f32.xlu0 %v803_v30 }
 0x24b   : > { %837 = vadd.xlane.f32.xlu1 %v806_v33 }
 0x24c   : > { %835 = vadd.xlane.f32.xlu0 %v805_v0 }
 0x278   : > { %v697_v61 = vpop.xlane.xlu1 %696 }
 0x279   : > { %v695_v16 = vpop.xlane.xlu0 %694  ;;  %1480 = vlog2.f32 %v697_v61 }
 0x27a   : > { %1482 = vrcp.f32 %v697_v61 }
 0x27b   : > { %1484 = vlog2.f32 %v695_v16 }
 0x27c   : > { %v701_v49 = vpop.xlane.xlu1 %700  ;;  %1486 = vrcp.f32 %v695_v16 }
 0x27d   : > { %v699_v48 = vpop.xlane.xlu0 %698  ;;  %1488 = vlog2.f32 %v701_v49 }
 0x27e   : > { %1490 = vrcp.f32 %v701_v49 }
 0x27f   : > { %1492 = vlog2.f32 %v699_v48 }
 0x280   : > { %v705_v21 = vpop.xlane.xlu1 %704  ;;  %1494 = vrcp.f32 %v699_v48  ;;  %v2730_v48 = vld [vmem:[#allocation4_spill] sm:$0xff] }
 0x281   : > { %v703_v15 = vpop.xlane.xlu0 %702  ;;  %1496 = vlog2.f32 %v705_v21 }
 0x282   : > { %1498 = vrcp.f32 %v705_v21 }
 0x283   : > { %1500 = vlog2.f32 %v703_v15 }
 0x284   : > { %v709_v51 = vpop.xlane.xlu1 %708  ;;  %1502 = vrcp.f32 %v703_v15  ;;  %v2731_v15 = vld [vmem:[#allocation5_spill] sm:$0xff] }
 0x285   : > { %v707_v4 = vpop.xlane.xlu0 %706  ;;  %1504 = vlog2.f32 %v709_v51 }
 0x286   : > { %v2231_v9 = vpop.eup %1480  ;;  %1506 = vrcp.f32 %v709_v51 }
 0x287   : > { %v2233_v11 = vpop.eup %1482  ;;  %1508 = vlog2.f32 %v707_v4  ;;  %v745_v2 = vmul.f32 0.6931472, %v2231_v9 }
 0x288   : > { %v713_v29 = vpop.xlane.xlu1 %712  ;;  %v2235_v27 = vpop.eup %1484  ;;  %1510 = vrcp.f32 %v707_v4  ;;  %v2732_v4 = vld [vmem:[#allocation6_spill] sm:$0xff] }
 0x289   : > { %v711_v32 = vpop.xlane.xlu0 %710  ;;  %v2237_v52 = vpop.eup %1486  ;;  %1512 = vlog2.f32 %v713_v29  ;;  %v743_v18 = vmul.f32 0.6931472, %v2235_v27 }
 0x28a   : > { %v2241_v28 = vpop.eup %1488  ;;  %1514 = vrcp.f32 %v713_v29  ;;  %v2737_v29 = vld [vmem:[#allocation11_spill] sm:$0xff] }
 0x28b   : > { %v2243_v31 = vpop.eup %1490  ;;  %v749_v44 = vmul.f32 0.6931472, %v2241_v28 }
 0x28c   : > { %v2219_v20 = vpop.xlane.xlu1 %716  ;;  %v1493_v26 = vpop.eup %1492 }
 0x28d   : > { %v2221_v56 = vpop.xlane.xlu0 %714  ;;  %v2245_v36 = vpop.eup %1494  ;;  %v747_v13 = vmul.f32 0.6931472, %v1493_v26 }
 0x28e   : > { %2728 = vst [vmem:[#allocation42_spill] sm:$0xff] %v2245_v36  ;;  %v2249_v33 = vpop.eup %1496  ;;  %v727_v36 = vsub.f32 %v2732_v4, %v2032_v17  ;;  %v730_v17 = vsub.f32 %v2735_v22, %v2046_v41 }
 0x28f   : > { %v2253_v61 = vpop.eup %1498 }
 0x290   : > { %v2223_v34 = vpop.xlane.xlu1 %720  ;;  %2729 = vst [vmem:[#allocation43_spill] sm:$0xff] %v2253_v61  ;;  %v1501_v49 = vpop.eup %1500  ;;  %v775_v8 = vsub.f32 %v727_v36, %v745_v2 }
 0x291   : > { %v2225_v3 = vpop.xlane.xlu0 %718  ;;  %v751_v9 = vmul.f32 0.6931472, %v1501_v49 }
 0x294   : > { %v2227_v43 = vpop.xlane.xlu1 %724 }
 0x295   : > { %v2229_v19 = vpop.xlane.xlu0 %722 }
 0x296   : > { %2727 = vst [vmem:[#allocation41_spill] sm:$0xff] %v2229_v19 }
 0x298   : > { %v971_v35 = vpop.xlane.xlu1 %970 }
 0x299   : > { %v973_v55 = vpop.xlane.xlu0 %972 }
 0x29a   : > { %1516 = vlog2.f32 %v973_v55  ;;  %v2739_v55 = vld [vmem:[#allocation13_spill] sm:$0xff] }
 0x29b   : > { %1518 = vlog2.f32 %v971_v35  ;;  %v2734_v35 = vld [vmem:[#allocation8_spill] sm:$0xff] }
 0x29c   : > { %v975_v10 = vpop.xlane.xlu1 %974  ;;  %1520 = vlog2.f32 %v711_v32 }
 0x29d   : > { %v977_v50 = vpop.xlane.xlu0 %976  ;;  %1522 = vrcp.f32 %v711_v32  ;;  %v2263_v32 = vpop.eup %1502 }
 0x29e   : > { %1524 = vlog2.f32 %v977_v50  ;;  %2733 = vst [vmem:[#allocation4_spill] sm:$0xff] %v2263_v32  ;;  %v2736_v50 = vld [vmem:[#allocation10_spill] sm:$0xff]  ;;  %v2274_v51 = vpop.eup %1504  ;;  %v2738_v32 = vld [vmem:[#allocation12_spill] sm:$0xff] }
 0x29f   : > { %1526 = vlog2.f32 %v975_v10  ;;  %v2284_v54 = vpop.eup %1506  ;;  %v729_v10 = vsub.f32 %v2731_v15, %v2038_v63 }
 0x2a0   : > { %v979_v62 = vpop.xlane.xlu1 %978  ;;  %1528 = vlog2.f32 %v2219_v20  ;;  %2740 = vst [vmem:[#allocation5_spill] sm:$0xff] %v2284_v54  ;;  %v2293_v61 = vpop.eup %1508  ;;  %v731_v54 = vsub.f32 %v2734_v35, %v2044_v42 }
 0x2a1   : > { %v981_v47 = vpop.xlane.xlu0 %980  ;;  %v2301_v59 = vpop.eup %1510  ;;  %v777_v49 = vsub.f32 %v729_v10, %v749_v44 }
 0x2a2   : > { %1530 = vlog2.f32 %v981_v47  ;;  %v2312_v1 = vpop.eup %1512 }
 0x2a3   : > { %1532 = vrcp.f32 %v2219_v20  ;;  %v726_v20 = vsub.f32 %v2730_v48, %v2034_v12  ;;  %v2323_v63 = vpop.eup %1514 }
 0x2a4   : > { %v2239_v57 = vpop.xlane.xlu1 %982  ;;  %1534 = vlog2.f32 %v979_v62  ;;  %v728_v62 = vsub.f32 %v1785_v39, %v2040_v58 }
 0x2a5   : > { %v985_v6 = vpop.xlane.xlu0 %984  ;;  %1536 = vlog2.f32 %v2221_v56 }
 0x2a6   : > { %1538 = vrcp.f32 %v2221_v56  ;;  %v753_v56 = vmul.f32 0.6931472, %v2249_v33  ;;  %v774_v33 = vsub.f32 %v726_v20, %v743_v18  ;;  %v776_v37 = vsub.f32 %v728_v62, %v747_v13 }
 0x2a7   : > { %1540 = vlog2.f32 %v985_v6  ;;  %v1517_v42 = vpop.eup %1516  ;;  %v2751_v18 = vsub.f32 %v2732_v4, %v2006_v46 }
 0x2a8   : > { %v2247_v30 = vpop.xlane.xlu1 %986  ;;  %1542 = vlog2.f32 %v2239_v57  ;;  %v1519_v14 = vpop.eup %1518  ;;  %v1021_v19 = vmul.f32 0.6931472, %v1517_v42  ;;  %v2362_v7 = vsub.f32 %v731_v54, %v753_v56  ;;  %v2364_v42 = vsub.f32 %v730_v17, %v751_v9 }
 0x2a9   : > { %v2251_v0 = vpop.xlane.xlu0 %988  ;;  %1544 = vlog2.f32 %v2223_v34  ;;  %v2342_v58 = vpop.eup %1520  ;;  %v1019_v41 = vmul.f32 0.6931472, %v1519_v14  ;;  %v2752_v54 = vsub.f32 %v2730_v48, %v2002_v38 }
 0x2aa   : > { %1546 = vrcp.f32 %v2223_v34  ;;  %v2350_v27 = vpop.eup %1522  ;;  %v1051_v44 = vsub.f32 %v2751_v18, %v1021_v19 }
 0x2ab   : > { %1548 = vlog2.f32 %v2251_v0  ;;  %v1525_v25 = vpop.eup %1524  ;;  %v1050_v10 = vsub.f32 %v2752_v54, %v1019_v41  ;;  %v2754_v41 = vld [vmem:[#allocation21_spill] sm:$0xff] }
 0x2ac   : > { %v2272_v21 = vpop.xlane.xlu1 %990  ;;  %1550 = vlog2.f32 %v2247_v30  ;;  %v1527_v34 = vpop.eup %1526  ;;  %v1025_v13 = vmul.f32 0.6931472, %v1525_v25  ;;  %v757_v25 = vmul.f32 0.6931472, %v2274_v51  ;;  %v2755_v56 = vsub.f32 %v2731_v15, %v2754_v41 }
 0x2ad   : > { %v2282_v16 = vpop.xlane.xlu0 %992  ;;  %1552 = vlog2.f32 %v2225_v3  ;;  %v2360_v28 = vpop.eup %1528 }
 0x2ae   : > { %1554 = vrcp.f32 %v2225_v3  ;;  %v1023_v3 = vmul.f32 0.6931472, %v1527_v34  ;;  %v1053_v9 = vsub.f32 %v2755_v56, %v1025_v13  ;;  %v2756_v34 = vld [vmem:[#allocation42_spill] sm:$0xff]  ;;  %v2765_v56 = vsub.f32 %v2736_v50, %v2050_v5 }
 0x2af   : > { %v1531_v36 = vpop.eup %1530  ;;  %1556 = vlog2.f32 %v2282_v16 }
 0x2b0   : > { %v2310_v47 = vpop.xlane.xlu1 %994  ;;  %v2373_v0 = vpop.eup %1532  ;;  %1558 = vlog2.f32 %v2272_v21  ;;  %v1029_v21 = vmul.f32 0.6931472, %v1531_v36 }
 0x2b1   : > { %v2321_v12 = vpop.xlane.xlu0 %996  ;;  %v1535_v46 = vpop.eup %1534  ;;  %1560 = vlog2.f32 %v2227_v43 }
 0x2b2   : > { %v2387_v48 = vpop.eup %1536  ;;  %1562 = vlog2.f32 %v2321_v12  ;;  %v1027_v18 = vmul.f32 0.6931472, %v1535_v46 }
 0x2b3   : > { %v2394_v17 = vpop.eup %1538  ;;  %1564 = vlog2.f32 %v2310_v47  ;;  %v2759_v47 = vld [vmem:[#allocation22_spill] sm:$0xff] }
 0x2b4   : > { %v2340_v6 = vpop.xlane.xlu1 %998  ;;  %1566 = vrcp.f32 %v2227_v43  ;;  %v2760_v54 = vsub.f32 %v2734_v35, %v2759_v47 }
 0x2b5   : > { %v2348_v57 = vpop.xlane.xlu0 %1000 }
 0x2b6   : > { %1568 = vlog2.f32 %v2348_v57 }
 0x2b7   : > { %1570 = vlog2.f32 %v2340_v6 }
 0x2b8   : > { %v810_v26 = vpop.xlane.xlu1 %809 }
 0x2b9   : > { %v842_v2 = vmul.f32 %v2233_v11, %v810_v26  ;;  %v808_v14 = vpop.xlane.xlu0 %807 }
 0x2ba   : > { %v840_v30 = vmul.f32 %v2237_v52, %v808_v14  ;;  %v2757_v14 = vld [vmem:[#allocation20_spill] sm:$0xff] }
 0x2bb   : > { %v1068_v11 = vsel %vm1066_vm5, %v842_v2, 0.0  ;;  %v1541_v2 = vpop.eup %1540  ;;  %v2758_v36 = vsub.f32 %v1785_v39, %v2757_v14 }
 0x2bc   : > { %v1084_v52 = vsel %vm1797_vm2, %v1051_v44, %v1068_v11  ;;  %v1067_v16 = vsel %vm1066_vm5, %v840_v30, 0.0  ;;  %v814_v38 = vpop.xlane.xlu1 %813  ;;  %v1543_v12 = vpop.eup %1542  ;;  %v755_v44 = vmul.f32 0.6931472, %v2293_v61  ;;  %v2761_v61 = vld [vmem:[#allocation43_spill] sm:$0xff] }
 0x2bd   : > { %v1100_v4 = vsel %vm597_vm3, %v775_v8, %v1084_v52  ;;  %v1083_v20 = vsel %vm1797_vm2, %v1050_v10, %v1067_v16  ;;  %v846_v51 = vmul.f32 %v2243_v31, %v814_v38  ;;  %v812_v62 = vpop.xlane.xlu0 %811  ;;  %v1052_v31 = vsub.f32 %v2758_v36, %v1023_v3  ;;  %v2417_v30 = vpop.eup %1544  ;;  %v2762_v38 = vld [vmem:[#allocation4_spill] sm:$0xff] }
 0x2be   : > { %1116 = vst [vmem:[%s1744_s29 + $0x8] sm:$0xff] %v1100_v4  ;;  %v1099_v26 = vsel %vm597_vm3, %v774_v33, %v1083_v20  ;;  %v844_v8 = vmul.f32 %v2756_v34, %v812_v62  ;;  %v1055_v10 = vsub.f32 %v2760_v54, %v1029_v21  ;;  %v2427_v52 = vpop.eup %1546  ;;  %v1033_v16 = vmul.f32 0.6931472, %v1541_v2  ;;  %v2771_v54 = vld [vmem:[#allocation25_spill] sm:$0xff] }
 0x2bf   : > { %1115 = vst [vmem:[%s1744_s29] sm:$0xff] %v1099_v26  ;;  %v1070_v15 = vsel %vm1066_vm5, %v846_v51, 0.0  ;;  %v1549_v4 = vpop.eup %1548  ;;  %v1031_v62 = vmul.f32 0.6931472, %v1543_v12 }
 0x2c0   : > { %v1086_v33 = vsel %vm1797_vm2, %v1053_v9, %v1070_v15  ;;  %v1069_v39 = vsel %vm1066_vm5, %v844_v8, 0.0  ;;  %v818_v13 = vpop.xlane.xlu1 %817  ;;  %v1551_v57 = vpop.eup %1550  ;;  %v2766_v9 = vld [vmem:[#allocation41_spill] sm:$0xff]  ;;  %v761_v8 = vmul.f32 0.6931472, %v2312_v1 }
 0x2c1   : > { %v1102_v3 = vsel %vm597_vm3, %v777_v49, %v1086_v33  ;;  %v1085_v43 = vsel %vm1797_vm2, %v1052_v31, %v1069_v39  ;;  %v850_v11 = vmul.f32 %v2761_v61, %v818_v13  ;;  %v816_v46 = vpop.xlane.xlu0 %815  ;;  %v2763_v49 = vld [vmem:[#allocation23_spill] sm:$0xff]  ;;  %1572 = vlog2.f32 %v2766_v9  ;;  %v2449_v6 = vpop.eup %1552 }
 0x2c2   : > { %1118 = vst [vmem:[%s1744_s29 + $0x18] sm:$0xff] %v1102_v3  ;;  %v1101_v35 = vsel %vm597_vm3, %v776_v37, %v1085_v43  ;;  %v848_v21 = vmul.f32 %v2762_v38, %v816_v46  ;;  %v2764_v20 = vsub.f32 %v2735_v22, %v2763_v49  ;;  %v781_v37 = vsub.f32 %v2765_v56, %v757_v25  ;;  %v2767_v25 = vld [vmem:[#allocation5_spill] sm:$0xff]  ;;  %v2458_v31 = vpop.eup %1554 }
 0x2c3   : > { %1117 = vst [vmem:[%s1744_s29 + $0x10] sm:$0xff] %v1101_v35  ;;  %v1072_v41 = vsel %vm1066_vm5, %v850_v11, 0.0  ;;  %v1037_v33 = vmul.f32 0.6931472, %v1549_v4  ;;  %v1557_v39 = vpop.eup %1556  ;;  %v2770_v13 = vsub.f32 %v2737_v29, %v2052_v23  ;;  %v1035_v43 = vmul.f32 0.6931472, %v1551_v57 }
 0x2c4   : > { %v1054_v51 = vsub.f32 %v2764_v20, %v1027_v18  ;;  %v1088_v26 = vsel %vm1797_vm2, %v1055_v10, %v1072_v41  ;;  %v1071_v22 = vsel %vm1066_vm5, %v848_v21, 0.0  ;;  %v822_v34 = vpop.xlane.xlu1 %821  ;;  %v2768_v18 = vld [vmem:[#allocation24_spill] sm:$0xff]  ;;  %v2772_v10 = vsub.f32 %v2737_v29, %v2771_v54  ;;  %v1559_v61 = vpop.eup %1558  ;;  %v2774_v21 = vld [vmem:[#allocation26_spill] sm:$0xff]  ;;  %v2776_v57 = vld [vmem:[#allocation27_spill] sm:$0xff] }
 0x2c5   : > { %v1104_v2 = vsel %vm597_vm3, %v2362_v7, %v1088_v26  ;;  %v854_v14 = vmul.f32 %v2767_v25, %v822_v34  ;;  %v820_v36 = vpop.xlane.xlu0 %819  ;;  %v2769_v15 = vsub.f32 %v2736_v50, %v2768_v18  ;;  %v780_v47 = vsub.f32 %v2770_v13, %v755_v44  ;;  %v1561_v29 = vpop.eup %1560  ;;  %v2778_v26 = vld [vmem:[#allocation34_spill] sm:$0xff]  ;;  %v2783_v13 = vld [vmem:[#allocation35_spill] sm:$0xff] }
 0x2c6   : > { %v1087_v5 = vsel %vm1797_vm2, %v1054_v51, %v1071_v22  ;;  %1120 = vst [vmem:[%s1744_s29 + $0x28] sm:$0xff] %v1104_v2  ;;  %v852_v7 = vmul.f32 %v2301_v59, %v820_v36  ;;  %v1056_v3 = vsub.f32 %v2772_v10, %v1031_v62  ;;  %1574 = vrcp.f32 %v2766_v9  ;;  %v1563_v62 = vpop.eup %1562  ;;  %v2780_v18 = vld [vmem:[#allocation14_spill] sm:$0xff]  ;;  %v2785_v10 = vld [vmem:[#allocation15_spill] sm:$0xff] }
 0x2c7   : > { %v1057_v12 = vsub.f32 %v2769_v15, %v1033_v16  ;;  %v1103_v1 = vsel %vm597_vm3, %v2364_v42, %v1087_v5  ;;  %v1074_v50 = vsel %vm1066_vm5, %v854_v14, 0.0  ;;  %v759_v42 = vmul.f32 0.6931472, %v2342_v58  ;;  %v1565_v9 = vpop.eup %1564  ;;  %v2781_v15 = vld [vmem:[#allocation28_spill] sm:$0xff] }
 0x2c8   : > { %1119 = vst [vmem:[%s1744_s29 + $0x20] sm:$0xff] %v1103_v1  ;;  %v1073_v23 = vsel %vm1066_vm5, %v852_v7, 0.0  ;;  %v826_v44 = vpop.xlane.xlu1 %825  ;;  %v2773_v11 = vsub.f32 %v2738_v32, %v2058_v24  ;;  %v2775_v4 = vsub.f32 %v2738_v32, %v2774_v21  ;;  %v1041_v20 = vmul.f32 0.6931472, %v1557_v39  ;;  %v1567_v5 = vpop.eup %1566 }
 0x2c9   : > { %v1090_v59 = vsel %vm1797_vm2, %v1057_v12, %v1074_v50  ;;  %v1089_v58 = vsel %vm1797_vm2, %v1056_v3, %v1073_v23  ;;  %v858_v35 = vmul.f32 %v2323_v63, %v826_v44  ;;  %v824_v38 = vpop.xlane.xlu0 %823  ;;  %v765_v41 = vmul.f32 0.6931472, %v2360_v28  ;;  %v1569_v39 = vpop.eup %1568  ;;  %v2786_v3 = vld [vmem:[#allocation29_spill] sm:$0xff] }
 0x2ca   : > { %v783_v46 = vsub.f32 %v2773_v11, %v761_v8  ;;  %v1106_v16 = vsel %vm597_vm3, %v781_v37, %v1090_v59  ;;  %v1059_v49 = vsub.f32 %v2775_v4, %v1037_v33  ;;  %v1105_v51 = vsel %vm597_vm3, %v780_v47, %v1089_v58  ;;  %v2788_v59 = vld [vmem:[#allocation36_spill] sm:$0xff] }
 0x2cb   : > { %1122 = vst [vmem:[%s1744_s29 + $0x38] sm:$0xff] %v1106_v16  ;;  %v856_v24 = vmul.f32 %v2350_v27, %v824_v38  ;;  %v2777_v56 = vsub.f32 %v2739_v55, %v2776_v57  ;;  %v1039_v63 = vmul.f32 0.6931472, %v1559_v61  ;;  %1121 = vst [vmem:[%s1744_s29 + $0x30] sm:$0xff] %v1105_v51  ;;  %v1076_v32 = vsel %vm1066_vm5, %v858_v35, 0.0  ;;  %v2790_v35 = vld [vmem:[#allocation37_spill] sm:$0xff] }
 0x2cc   : > { %v2779_v22 = vsub.f32 %v2739_v55, %v2778_v26  ;;  %v763_v27 = vmul.f32 0.6931472, %v2387_v48  ;;  %v1092_v28 = vsel %vm1797_vm2, %v1059_v49, %v1076_v32  ;;  %v830_v2 = vpop.xlane.xlu1 %829  ;;  %v769_v25 = vmul.f32 0.6931472, %v2417_v30  ;;  %v2792_v51 = vld [vmem:[#allocation30_spill] sm:$0xff] }
 0x2cd   : > { %v1058_v37 = vsub.f32 %v2777_v56, %v1035_v43  ;;  %v1075_v8 = vsel %vm1066_vm5, %v856_v24, 0.0  ;;  %v1108_v14 = vsel %vm597_vm3, %v783_v46, %v1092_v28  ;;  %v862_v36 = vmul.f32 %v2373_v0, %v830_v2  ;;  %v828_v48 = vpop.xlane.xlu0 %827  ;;  %v2798_v2 = vld [vmem:[#allocation18_spill] sm:$0xff] }
 0x2ce   : > { %v782_v34 = vsub.f32 %v2779_v22, %v759_v42  ;;  %v2782_v12 = vsub.f32 %v2780_v18, %v2781_v15  ;;  %v1045_v1 = vmul.f32 0.6931472, %v1563_v62  ;;  %1124 = vst [vmem:[%s1744_s29 + $0x48] sm:$0xff] %v1108_v14  ;;  %v860_v30 = vmul.f32 %v2394_v17, %v828_v48  ;;  %v1571_v42 = vpop.eup %1570  ;;  %v2800_v48 = vld [vmem:[#allocation19_spill] sm:$0xff]  ;;  %v2801_v15 = vld [vmem:[#allocation32_spill] sm:$0xff] }
 0x2cf   : > { %v1091_v55 = vsel %vm1797_vm2, %v1058_v37, %v1075_v8  ;;  %v2784_v47 = vsub.f32 %v2780_v18, %v2783_v13  ;;  %v2787_v0 = vsub.f32 %v2785_v10, %v2786_v3  ;;  %v1043_v50 = vmul.f32 0.6931472, %v1565_v9  ;;  %v1573_v58 = vpop.eup %1572  ;;  %v2797_v8 = vld [vmem:[#allocation39_spill] sm:$0xff] }
 0x2d0   : > { %v1061_v33 = vsub.f32 %v2782_v12, %v1041_v20  ;;  %v1107_v7 = vsel %vm597_vm3, %v782_v34, %v1091_v55  ;;  %v1078_v61 = vsel %vm1066_vm5, %v862_v36, 0.0  ;;  %v2789_v23 = vsub.f32 %v2785_v10, %v2788_v59  ;;  %v834_v16 = vpop.xlane.xlu1 %833  ;;  %v2799_v36 = vld [vmem:[#allocation40_spill] sm:$0xff] }
 0x2d1   : > { %v785_v54 = vsub.f32 %v2784_v47, %v765_v41  ;;  %v1060_v43 = vsub.f32 %v2787_v0, %v1039_v63  ;;  %1123 = vst [vmem:[%s1744_s29 + $0x40] sm:$0xff] %v1107_v7  ;;  %v767_v44 = vmul.f32 0.6931472, %v2449_v6  ;;  %v1077_v46 = vsel %vm1066_vm5, %v860_v30, 0.0  ;;  %v832_v20 = vpop.xlane.xlu0 %831  ;;  %v2794_v63 = vld [vmem:[#allocation31_spill] sm:$0xff] }
 0x2d2   : > { %v784_v17 = vsub.f32 %v2789_v23, %v763_v27  ;;  %v1094_v11 = vsel %vm1797_vm2, %v1061_v33, %v1078_v61  ;;  %v2791_v38 = vsub.f32 %v2743_v45, %v2790_v35  ;;  %v866_v6 = vmul.f32 %v2427_v52, %v834_v16 }
 0x2d3   : > { %v1110_v4 = vsel %vm597_vm3, %v785_v54, %v1094_v11  ;;  %v1093_v49 = vsel %vm1797_vm2, %v1060_v43, %v1077_v46  ;;  %v2793_v24 = vsub.f32 %v2743_v45, %v2792_v51  ;;  %v1049_v41 = vmul.f32 0.6931472, %v1569_v39  ;;  %v1575_v28 = vpop.eup %1574  ;;  %v2803_v39 = vld [vmem:[#allocation33_spill] sm:$0xff] }
 0x2d4   : > { %v787_v21 = vsub.f32 %v2791_v38, %v769_v25  ;;  %1126 = vst [vmem:[%s1744_s29 + $0x58] sm:$0xff] %v1110_v4  ;;  %v1109_v57 = vsel %vm597_vm3, %v784_v17, %v1093_v49  ;;  %v864_v56 = vmul.f32 %v2458_v31, %v832_v20  ;;  %v773_v37 = vmul.f32 0.6931472, %v1561_v29  ;;  %v838_v29 = vpop.xlane.xlu1 %837 }
 0x2d5   : > { %v1063_v62 = vsub.f32 %v2793_v24, %v1045_v1  ;;  %v2795_v32 = vsub.f32 %v2744_v53, %v2794_v63  ;;  %v1047_v26 = vmul.f32 0.6931472, %v1571_v42  ;;  %1125 = vst [vmem:[%s1744_s29 + $0x50] sm:$0xff] %v1109_v57  ;;  %v1080_v52 = vsel %vm1066_vm5, %v866_v6, 0.0  ;;  %v836_v55 = vpop.xlane.xlu0 %835 }
 0x2d6   : > { %v2796_v45 = vsub.f32 %v2744_v53, %v2750_v60  ;;  %v771_v34 = vmul.f32 0.6931472, %v1573_v58  ;;  %v1079_v31 = vsel %vm1066_vm5, %v864_v56, 0.0  ;;  %v741_v25 = vsub.f32 %v2798_v2, %v2797_v8 }
 0x2d7   : > { %v1062_v9 = vsub.f32 %v2795_v32, %v1043_v50  ;;  %v1096_v27 = vsel %vm1797_vm2, %v1063_v62, %v1080_v52  ;;  %v870_v60 = vmul.f32 %v1567_v5, %v838_v29  ;;  %v740_v18 = vsub.f32 %v2800_v48, %v2799_v36 }
 0x2d8   : > { %v786_v22 = vsub.f32 %v2796_v45, %v767_v44  ;;  %v1112_v14 = vsel %vm597_vm3, %v787_v21, %v1096_v27  ;;  %v2802_v12 = vsub.f32 %v2798_v2, %v2801_v15  ;;  %v868_v7 = vmul.f32 %v1575_v28, %v836_v55 }
 0x2d9   : > { %v1095_v53 = vsel %vm1797_vm2, %v1062_v9, %v1079_v31  ;;  %1128 = vst [vmem:[%s1744_s29 + $0x68] sm:$0xff] %v1112_v14  ;;  %v789_v30 = vsub.f32 %v741_v25, %v773_v37  ;;  %v2804_v13 = vsub.f32 %v2800_v48, %v2803_v39  ;;  %v1082_v47 = vsel %vm1066_vm5, %v870_v60, 0.0 }
 0x2da   : > { %v1065_v33 = vsub.f32 %v2802_v12, %v1049_v41  ;;  %v1111_v1 = vsel %vm597_vm3, %v786_v22, %v1095_v53  ;;  %v788_v54 = vsub.f32 %v740_v18, %v771_v34  ;;  %v1081_v3 = vsel %vm1066_vm5, %v868_v7, 0.0 }
 0x2db   : > { %v1064_v5 = vsub.f32 %v2804_v13, %v1047_v26  ;;  %1127 = vst [vmem:[%s1744_s29 + $0x60] sm:$0xff] %v1111_v1 }
 0x2dc   : > { %v1098_v10 = vsel %vm1797_vm2, %v1065_v33, %v1082_v47 }
 0x2dd   : > { %v1114_v0 = vsel %vm597_vm3, %v789_v30, %v1098_v10  ;;  %v1097_v43 = vsel %vm1797_vm2, %v1064_v5, %v1081_v3 }
 0x2de   : > { %1130 = vst [vmem:[%s1744_s29 + $0x78] sm:$0xff] %v1114_v0  ;;  %v1113_v50 = vsel %vm597_vm3, %v788_v54, %v1097_v43 }
 0x2df   : > { %1129 = vst [vmem:[%s1744_s29 + $0x70] sm:$0xff] %v1113_v50 }
 0x2e0 PF: > { %s13_s18 = sadd.s32 1, %s1630_s18   ;;  %s2805_s12 = smov %s1610_s13 }
 0x2e1   : > { %p10_p0 = scmp.ge.s32.totalorder %s13_s18, 6   ;;  %s2806_s13 = smov %s1704_s25 }
 0x2e2   : > { %s2807_s14 = smov %s1622_s16  ;;  %s2808_s15 = smov %s1626_s17 }
 0x2e3   : > { %s2809_s16 = smov %s2812_s19  ;;  %s2810_s17 = smov %s2816_s20 }
 0x2e4   :  { %12 = sbr.rel (!%p10_p0) target bundleno = 4 (0x4), region = 116 }

</bundles_post_ra>
